<compile_context>
chip_gen: v6e
topology: v6e:2x2x1
jax: 0.10.0
libtpu: 0.0.40
codegen_flags: <defaults>
</compile_context>

<pallas_src>
import functools

import jax
import jax.numpy as jnp
from jax.experimental import pallas as pl
from jax.experimental.pallas import tpu as pltpu

NEG_SLOPE = 0.01   # nn.LeakyReLU() default negative_slope
NEG_BIG = -1e30    # additive bias for cross-batch entries (exp -> 0)


def _cdiv(a, b):
    return -(-a // b)


def _tpu_features():
    """(two_tensorcores, bf16_eup) from the local device kind; conservative defaults."""
    kind = ""
    try:
        dev = jax.devices()[0]
        if dev.platform == "tpu":
            kind = dev.device_kind.lower()
    except Exception:
        pass
    two_tc = ("v7" in kind) or ("7x" in kind)          # v7x: 2 TensorCores / chip
    bf16_eup = ("v6" in kind) or two_tc                # bf16-capable EUP (v6e, v7x)
    return two_tc, bf16_eup


def _choose_block_b(B, N, min_steps):
    """Batches per grid step: lane-dense (BB*N >= 128 when possible), BBN capped at
    512 (bounded quadratic tile, v7x VMEM-safe), and at least `min_steps` grid steps
    (2 on v7x to feed both TCs, 1 on single-TC v5e/v6e)."""
    if N >= 128:
        # Block-diagonal waste factor equals BB; at large N run true per-batch attention.
        return 1
    bb = min(B, max(1, _cdiv(128, N)))
    while (2 * bb * N <= 512) and (2 * bb <= B) and (_cdiv(B, 2 * bb) >= min_steps):
        bb *= 2
    return bb


def _gat_kernel(x_ref, w_ref, bidc_ref, bidr_ref, o_ref, *, bf16_exp):
    # x_ref:    (T, BBN)  VMEM, lane-dense slab of BB batches (BBN = BB*N)
    # w_ref:    (2, T)    SMEM, rows [w1; w2] read as scalars
    # bidc_ref: (BBN, 1)  VMEM int32, batch-within-block id per row
    # bidr_ref: (1, BBN)  VMEM int32, batch-within-block id per column
    x = x_ref[...]                                                 # (T, BBN) f32
    T, BBN = x.shape

    # --- weight projection on the VPU (w scalars from SMEM), no MXU involved ---
    a_row = w_ref[0, 0] * x[0:1, :]                                # (1, BBN): w1 . X[:, i]
    b_row = w_ref[1, 0] * x[0:1, :]                                # (1, BBN): w2 . X[:, j]
    for t in range(1, T):                                          # T is small & static
        xt = x[t:t + 1, :]
        a_row = a_row + w_ref[0, t] * xt
        b_row = b_row + w_ref[1, t] * xt
    b_col = jnp.transpose(b_row)                                   # (BBN, 1)

    # s[j, i] = a[i] + b[j]  (transposed e); LeakyReLU.
    s = b_col + a_row                                              # (BBN, BBN)
    leaky = jnp.where(s >= 0, s, NEG_SLOPE * s)

    # Block-diagonal masking built in-kernel (no (BBN,BBN) mask inputs):
    #   diagonal -> 0 (as in the PyTorch reference), cross-batch -> -1e30.
    rid = jax.lax.broadcasted_iota(jnp.int32, (BBN, BBN), 0)
    cid = jax.lax.broadcasted_iota(jnp.int32, (BBN, BBN), 1)
    same = bidc_ref[...] == bidr_ref[...]                          # (BBN, BBN) via broadcast
    eT = jnp.where(rid == cid, 0.0, jnp.where(same, leaky, NEG_BIG))

    # torch.softmax(e, dim=1) == softmax over the last axis of eT (per batch block).
    m = jnp.max(eT, axis=-1, keepdims=True)                        # >= 0 (diag entry is 0)
    z = eT - m                                                     # keep the -1e30 math in f32
    if bf16_exp:
        p = jnp.exp(z.astype(jnp.bfloat16)).astype(jnp.float32)    # bf16 EUP (v6e/v7x)
    else:
        p = jnp.exp(z)
    denom = jnp.sum(p, axis=-1, keepdims=True)                     # (BBN, 1) > 0
    alphaT = p * pl.reciprocal(denom)                              # exact reciprocal of the column

    # h[t, c*N+i] = sum_k X[c,t,k] * alpha[c,i,k]  == (x @ block-diag alphaT)[t, c*N+i]
    h = jnp.dot(x, alphaT, preferred_element_type=jnp.float32)     # (T, BBN) on the MXU
    o_ref[...] = jax.nn.sigmoid(h).astype(o_ref.dtype)


@functools.partial(jax.jit, static_argnames=("block_b", "use_bf16_exp"))
def graph_attention_layer(X, W, block_b=None, use_bf16_exp=None):
    """X: (B, T, N) float32, W: (1, 2*T) float32 (nn.Linear weight) -> (B, T, N)."""
    B, T, N = X.shape
    two_tc, bf16_ok = _tpu_features()
    if use_bf16_exp is None:
        use_bf16_exp = bf16_ok
    BB = block_b if block_b is not None else _choose_block_b(B, N, 2 if two_tc else 1)
    G = _cdiv(B, BB)
    Bp = G * BB
    if Bp != B:  # zero-pad the batch; padded rows are sliced off below (no NaN risk)
        X = jnp.pad(X, ((0, Bp - B), (0, 0), (0, 0)))
    BBN = BB * N

    # Lane-dense slab: (G, T, BB*N); within-block column index = c*N + n.
    Xr = X.reshape(G, BB, T, N).transpose(0, 2, 1, 3).reshape(G, T, BBN)
    w_stack = W.reshape(2, T).astype(jnp.float32)                  # rows: [w1; w2] (SMEM)

    # Tiny batch-id vectors (~KB) replacing the old quadratic (BBN,BBN) masks.
    bid = jnp.arange(BBN, dtype=jnp.int32) // N
    bid_col = bid.reshape(BBN, 1)
    bid_row = bid.reshape(1, BBN)

    cost = pl.CostEstimate(
        flops=int(G * (4 * T * BBN + 2 * T * BBN * BBN + 10 * BBN * BBN)),
        transcendentals=int(G * (BBN * BBN + T * BBN + BBN)),
        bytes_accessed=int(4 * (2 * G * T * BBN + 2 * T + 2 * BBN)),
    )

    kernel = functools.partial(_gat_kernel, bf16_exp=bool(use_bf16_exp))

    out = pl.pallas_call(
        kernel,
        out_shape=jax.ShapeDtypeStruct((G, T, BBN), X.dtype),
        grid=(G,),
        in_specs=[
            pl.BlockSpec((None, T, BBN), lambda g: (g, 0, 0)),         # per-step slab of BB batches
            pl.BlockSpec(memory_space=pltpu.MemorySpace.SMEM),         # stacked weights in SMEM
            pl.BlockSpec((BBN, 1), lambda g: (0, 0)),                  # row batch ids (constant)
            pl.BlockSpec((1, BBN), lambda g: (0, 0)),                  # col batch ids (constant)
        ],
        out_specs=pl.BlockSpec((None, T, BBN), lambda g: (g, 0, 0)),
        compiler_params=pltpu.CompilerParams(
            dimension_semantics=("parallel",),
            vmem_limit_bytes=32 * 1024 * 1024,
        ),
        cost_estimate=cost,
    )(Xr, w_stack, bid_col, bid_row)

    out = out.reshape(G, T, BB, N).transpose(0, 2, 1, 3).reshape(Bp, T, N)
    return out[:B]


def _reference(X, W):
    """Pure-JAX mirror of the PyTorch forward (high precision, for correctness check)."""
    B, T, N = X.shape
    w1, w2 = W[0, :T], W[0, T:]
    hi = jax.lax.Precision.HIGHEST
    a = jnp.einsum("t,btn->bn", w1, X, precision=hi)
    b = jnp.einsum("t,btn->bn", w2, X, precision=hi)
    e = a[:, :, None] + b[:, None, :]
    e = jnp.where(e >= 0, e, NEG_SLOPE * e)
    e = jnp.where(jnp.eye(N, dtype=bool)[None], 0.0, e)
    alpha = jax.nn.softmax(e, axis=1)
    h = jnp.einsum("bik,btk->bti", alpha, X, precision=hi)
    return jax.nn.sigmoid(h)


if __name__ == "__main__":
    B, T, N = 16, 8, 16  # batch, len_ts, number of nodes/series
    key = jax.random.PRNGKey(0)
    kx, kw = jax.random.split(key)

    X = jax.random.normal(kx, (B, T, N), dtype=jnp.float32)
    # nn.Linear(2*T, 1, bias=False): weight shape (1, 2*T), kaiming-uniform-style bound
    bound = 1.0 / (2.0 * T) ** 0.5
    W = jax.random.uniform(kw, (1, 2 * T), dtype=jnp.float32, minval=-bound, maxval=bound)

    _, use_bf16 = _tpu_features()
    out = graph_attention_layer(X, W, use_bf16_exp=use_bf16)
    jax.block_until_ready(out)

    ref = _reference(X, W)
    assert out.shape == (B, T, N)
    # Exact-reciprocal f32 path is tight; the bf16-exp path (v6e/v7x) trades a small,
    # renormalized exp error for ~2x EUP throughput on the dominant per-step term.
    tol = 2e-2 if use_bf16 else 1e-3
    assert jnp.allclose(out, ref, atol=tol, rtol=tol), "Pallas kernel mismatch vs reference"
    print("KERNEL_OK")
</pallas_src>

<mosaic_0001>
module attributes {stable_mosaic.version = 11 : i64} {
  func.func @_gat_kernel(%arg0: i32, %arg1: memref<1x8x256xf32, #tpu.memory_space<vmem>>, %arg2: memref<2x8xf32, #tpu.memory_space<smem>>, %arg3: memref<256x1xi32, #tpu.memory_space<vmem>>, %arg4: memref<1x256xi32, #tpu.memory_space<vmem>>, %arg5: memref<1x8x256xf32, #tpu.memory_space<vmem>>) attributes {dimension_semantics = [#tpu.dimension_semantics<parallel>], iteration_bounds = array<i64: 1>, scalar_prefetch = 0 : i64, scratch_operands = 0 : i64, tpu.core_type = #tpu.core_type<tc>, window_params = [{transform_indices = @transform_0, window_bounds = array<i64: 1, 8, 256>}, {transform_indices = @transform_1, window_bounds = array<i64: 2, 8>}, {pipeline_mode = #tpu.pipeline_mode<synchronous>, transform_indices = @transform_2, window_bounds = array<i64: 256, 1>}, {pipeline_mode = #tpu.pipeline_mode<synchronous>, transform_indices = @transform_3, window_bounds = array<i64: 1, 256>}, {transform_indices = @transform_4, window_bounds = array<i64: 1, 8, 256>}]} {
    %c0 = arith.constant 0 : index
    %c0_0 = arith.constant 0 : index
    %c0_1 = arith.constant 0 : index
    %0 = vector.load %arg1[%c0, %c0_0, %c0_1] : memref<1x8x256xf32, #tpu.memory_space<vmem>>, vector<1x8x256xf32>
    %1 = vector.shape_cast %0 : vector<1x8x256xf32> to vector<8x256xf32>
    %c0_2 = arith.constant 0 : index
    %c0_3 = arith.constant 0 : index
    %2 = memref.load %arg2[%c0_2, %c0_3] : memref<2x8xf32, #tpu.memory_space<smem>>
    %3 = vector.extract_strided_slice %1 {offsets = [0, 0], sizes = [1, 256], strides = [1, 1]} : vector<8x256xf32> to vector<1x256xf32>
    %4 = vector.broadcast %2 : f32 to vector<1x256xf32>
    %5 = arith.mulf %4, %3 : vector<1x256xf32>
    %c1 = arith.constant 1 : index
    %c0_4 = arith.constant 0 : index
    %6 = memref.load %arg2[%c1, %c0_4] : memref<2x8xf32, #tpu.memory_space<smem>>
    %7 = vector.extract_strided_slice %1 {offsets = [0, 0], sizes = [1, 256], strides = [1, 1]} : vector<8x256xf32> to vector<1x256xf32>
    %8 = vector.broadcast %6 : f32 to vector<1x256xf32>
    %9 = arith.mulf %8, %7 : vector<1x256xf32>
    %10 = vector.extract_strided_slice %1 {offsets = [1, 0], sizes = [1, 256], strides = [1, 1]} : vector<8x256xf32> to vector<1x256xf32>
    %c0_5 = arith.constant 0 : index
    %c1_6 = arith.constant 1 : index
    %11 = memref.load %arg2[%c0_5, %c1_6] : memref<2x8xf32, #tpu.memory_space<smem>>
    %12 = vector.broadcast %11 : f32 to vector<1x256xf32>
    %13 = arith.mulf %12, %10 : vector<1x256xf32>
    %14 = arith.addf %5, %13 : vector<1x256xf32>
    %c1_7 = arith.constant 1 : index
    %c1_8 = arith.constant 1 : index
    %15 = memref.load %arg2[%c1_7, %c1_8] : memref<2x8xf32, #tpu.memory_space<smem>>
    %16 = vector.broadcast %15 : f32 to vector<1x256xf32>
    %17 = arith.mulf %16, %10 : vector<1x256xf32>
    %18 = arith.addf %9, %17 : vector<1x256xf32>
    %19 = vector.extract_strided_slice %1 {offsets = [2, 0], sizes = [1, 256], strides = [1, 1]} : vector<8x256xf32> to vector<1x256xf32>
    %c0_9 = arith.constant 0 : index
    %c2 = arith.constant 2 : index
    %20 = memref.load %arg2[%c0_9, %c2] : memref<2x8xf32, #tpu.memory_space<smem>>
    %21 = vector.broadcast %20 : f32 to vector<1x256xf32>
    %22 = arith.mulf %21, %19 : vector<1x256xf32>
    %23 = arith.addf %14, %22 : vector<1x256xf32>
    %c1_10 = arith.constant 1 : index
    %c2_11 = arith.constant 2 : index
    %24 = memref.load %arg2[%c1_10, %c2_11] : memref<2x8xf32, #tpu.memory_space<smem>>
    %25 = vector.broadcast %24 : f32 to vector<1x256xf32>
    %26 = arith.mulf %25, %19 : vector<1x256xf32>
    %27 = arith.addf %18, %26 : vector<1x256xf32>
    %28 = vector.extract_strided_slice %1 {offsets = [3, 0], sizes = [1, 256], strides = [1, 1]} : vector<8x256xf32> to vector<1x256xf32>
    %c0_12 = arith.constant 0 : index
    %c3 = arith.constant 3 : index
    %29 = memref.load %arg2[%c0_12, %c3] : memref<2x8xf32, #tpu.memory_space<smem>>
    %30 = vector.broadcast %29 : f32 to vector<1x256xf32>
    %31 = arith.mulf %30, %28 : vector<1x256xf32>
    %32 = arith.addf %23, %31 : vector<1x256xf32>
    %c1_13 = arith.constant 1 : index
    %c3_14 = arith.constant 3 : index
    %33 = memref.load %arg2[%c1_13, %c3_14] : memref<2x8xf32, #tpu.memory_space<smem>>
    %34 = vector.broadcast %33 : f32 to vector<1x256xf32>
    %35 = arith.mulf %34, %28 : vector<1x256xf32>
    %36 = arith.addf %27, %35 : vector<1x256xf32>
    %37 = vector.extract_strided_slice %1 {offsets = [4, 0], sizes = [1, 256], strides = [1, 1]} : vector<8x256xf32> to vector<1x256xf32>
    %c0_15 = arith.constant 0 : index
    %c4 = arith.constant 4 : index
    %38 = memref.load %arg2[%c0_15, %c4] : memref<2x8xf32, #tpu.memory_space<smem>>
    %39 = vector.broadcast %38 : f32 to vector<1x256xf32>
    %40 = arith.mulf %39, %37 : vector<1x256xf32>
    %41 = arith.addf %32, %40 : vector<1x256xf32>
    %c1_16 = arith.constant 1 : index
    %c4_17 = arith.constant 4 : index
    %42 = memref.load %arg2[%c1_16, %c4_17] : memref<2x8xf32, #tpu.memory_space<smem>>
    %43 = vector.broadcast %42 : f32 to vector<1x256xf32>
    %44 = arith.mulf %43, %37 : vector<1x256xf32>
    %45 = arith.addf %36, %44 : vector<1x256xf32>
    %46 = vector.extract_strided_slice %1 {offsets = [5, 0], sizes = [1, 256], strides = [1, 1]} : vector<8x256xf32> to vector<1x256xf32>
    %c0_18 = arith.constant 0 : index
    %c5 = arith.constant 5 : index
    %47 = memref.load %arg2[%c0_18, %c5] : memref<2x8xf32, #tpu.memory_space<smem>>
    %48 = vector.broadcast %47 : f32 to vector<1x256xf32>
    %49 = arith.mulf %48, %46 : vector<1x256xf32>
    %50 = arith.addf %41, %49 : vector<1x256xf32>
    %c1_19 = arith.constant 1 : index
    %c5_20 = arith.constant 5 : index
    %51 = memref.load %arg2[%c1_19, %c5_20] : memref<2x8xf32, #tpu.memory_space<smem>>
    %52 = vector.broadcast %51 : f32 to vector<1x256xf32>
    %53 = arith.mulf %52, %46 : vector<1x256xf32>
    %54 = arith.addf %45, %53 : vector<1x256xf32>
    %55 = vector.extract_strided_slice %1 {offsets = [6, 0], sizes = [1, 256], strides = [1, 1]} : vector<8x256xf32> to vector<1x256xf32>
    %c0_21 = arith.constant 0 : index
    %c6 = arith.constant 6 : index
    %56 = memref.load %arg2[%c0_21, %c6] : memref<2x8xf32, #tpu.memory_space<smem>>
    %57 = vector.broadcast %56 : f32 to vector<1x256xf32>
    %58 = arith.mulf %57, %55 : vector<1x256xf32>
    %59 = arith.addf %50, %58 : vector<1x256xf32>
    %c1_22 = arith.constant 1 : index
    %c6_23 = arith.constant 6 : index
    %60 = memref.load %arg2[%c1_22, %c6_23] : memref<2x8xf32, #tpu.memory_space<smem>>
    %61 = vector.broadcast %60 : f32 to vector<1x256xf32>
    %62 = arith.mulf %61, %55 : vector<1x256xf32>
    %63 = arith.addf %54, %62 : vector<1x256xf32>
    %64 = vector.extract_strided_slice %1 {offsets = [7, 0], sizes = [1, 256], strides = [1, 1]} : vector<8x256xf32> to vector<1x256xf32>
    %c0_24 = arith.constant 0 : index
    %c7 = arith.constant 7 : index
    %65 = memref.load %arg2[%c0_24, %c7] : memref<2x8xf32, #tpu.memory_space<smem>>
    %66 = vector.broadcast %65 : f32 to vector<1x256xf32>
    %67 = arith.mulf %66, %64 : vector<1x256xf32>
    %68 = arith.addf %59, %67 : vector<1x256xf32>
    %c1_25 = arith.constant 1 : index
    %c7_26 = arith.constant 7 : index
    %69 = memref.load %arg2[%c1_25, %c7_26] : memref<2x8xf32, #tpu.memory_space<smem>>
    %70 = vector.broadcast %69 : f32 to vector<1x256xf32>
    %71 = arith.mulf %70, %64 : vector<1x256xf32>
    %72 = arith.addf %63, %71 : vector<1x256xf32>
    %73 = tpu.transpose %72, [1, 0] : vector<1x256xf32> -> vector<256x1xf32>
    %74 = vector.broadcast %73 : vector<256x1xf32> to vector<256x256xf32>
    %75 = vector.broadcast %68 : vector<1x256xf32> to vector<256x256xf32>
    %76 = arith.addf %74, %75 : vector<256x256xf32>
    %cst = arith.constant 0.000000e+00 : f32
    %77 = vector.broadcast %cst : f32 to vector<256x256xf32>
    %78 = arith.cmpf oge, %76, %77 : vector<256x256xf32>
    %cst_27 = arith.constant 0.00999999977 : f32
    %79 = vector.broadcast %cst_27 : f32 to vector<256x256xf32>
    %80 = arith.mulf %79, %76 : vector<256x256xf32>
    %81 = arith.select %78, %76, %80 : vector<256x256xi1>, vector<256x256xf32>
    %82 = tpu.iota {dimensions = array<i32: 0>} : vector<256x256xi32>
    %83 = tpu.iota {dimensions = array<i32: 1>} : vector<256x256xi32>
    %c0_28 = arith.constant 0 : index
    %c0_29 = arith.constant 0 : index
    %84 = vector.load %arg3[%c0_28, %c0_29] : memref<256x1xi32, #tpu.memory_space<vmem>>, vector<256x1xi32>
    %c0_30 = arith.constant 0 : index
    %c0_31 = arith.constant 0 : index
    %85 = vector.load %arg4[%c0_30, %c0_31] : memref<1x256xi32, #tpu.memory_space<vmem>>, vector<1x256xi32>
    %86 = vector.broadcast %84 : vector<256x1xi32> to vector<256x256xi32>
    %87 = vector.broadcast %85 : vector<1x256xi32> to vector<256x256xi32>
    %88 = arith.cmpi eq, %86, %87 : vector<256x256xi32>
    %89 = arith.cmpi eq, %82, %83 : vector<256x256xi32>
    %cst_32 = arith.constant -1.000000e+30 : f32
    %90 = vector.broadcast %cst_32 : f32 to vector<256x256xf32>
    %91 = arith.select %88, %81, %90 : vector<256x256xi1>, vector<256x256xf32>
    %cst_33 = arith.constant 0.000000e+00 : f32
    %92 = vector.broadcast %cst_33 : f32 to vector<256x256xf32>
    %93 = arith.select %89, %92, %91 : vector<256x256xi1>, vector<256x256xf32>
    %cst_34 = arith.constant dense<0xFF800000> : vector<256xf32>
    %94 = vector.multi_reduction <maximumf>, %93, %cst_34 [1] : vector<256x256xf32> to vector<256xf32>
    %95 = vector.shape_cast %94 : vector<256xf32> to vector<256x1xf32>
    %96 = vector.broadcast %95 : vector<256x1xf32> to vector<256x256xf32>
    %97 = arith.subf %93, %96 : vector<256x256xf32>
    %98 = math.exp %97 : vector<256x256xf32>
    %cst_35 = arith.constant dense<0.000000e+00> : vector<256xf32>
    %99 = vector.multi_reduction <add>, %98, %cst_35 [1] : vector<256x256xf32> to vector<256xf32>
    %100 = vector.shape_cast %99 : vector<256xf32> to vector<256x1xf32>
    %101 = tpu.reciprocal %100 : vector<256x1xf32> -> vector<256x1xf32>
    %102 = vector.broadcast %101 : vector<256x1xf32> to vector<256x256xf32>
    %103 = arith.mulf %98, %102 : vector<256x256xf32>
    %cst_36 = arith.constant dense<0.000000e+00> : vector<8x256xf32>
    %104 = tpu.matmul %1, %103, %cst_36 {dimension_numbers = #tpu.dot_dimension_numbers<[1], [0], [0], [1], [0, 0, 1, 1], [], []>} : vector<8x256xf32>, vector<256x256xf32>, vector<8x256xf32> -> vector<8x256xf32>
    %105 = arith.negf %104 : vector<8x256xf32>
    %106 = math.exp %105 : vector<8x256xf32>
    %cst_37 = arith.constant 1.000000e+00 : f32
    %107 = vector.broadcast %cst_37 : f32 to vector<8x256xf32>
    %108 = arith.addf %107, %106 : vector<8x256xf32>
    %109 = arith.divf %107, %108 : vector<8x256xf32>
    %c0_38 = arith.constant 0 : index
    %c0_39 = arith.constant 0 : index
    %c0_40 = arith.constant 0 : index
    %110 = vector.load %arg5[%c0_38, %c0_39, %c0_40] : memref<1x8x256xf32, #tpu.memory_space<vmem>>, vector<1x8x256xf32>
    %111 = vector.shape_cast %110 : vector<1x8x256xf32> to vector<8x256xf32>
    %112 = vector.shape_cast %109 : vector<8x256xf32> to vector<1x8x256xf32>
    tpu.vector_store %arg5[%c0_38, %c0_39, %c0_40], %112 {strides = array<i32>} : memref<1x8x256xf32, #tpu.memory_space<vmem>>, vector<1x8x256xf32>,
    return
  }
  func.func @transform_0(%arg0: i32) -> (i32, i32, i32) {
    %c0_i32 = arith.constant 0 : i32
    %c0_i32_0 = arith.constant 0 : i32
    %c0_i32_1 = arith.constant 0 : i32
    return %arg0, %c0_i32, %c0_i32_0 : i32, i32, i32
  }
  func.func @transform_1(%arg0: i32) -> (i32, i32) {
    %c0_i32 = arith.constant 0 : i32
    %c0_i32_0 = arith.constant 0 : i32
    %c0_i32_1 = arith.constant 0 : i32
    return %c0_i32, %c0_i32_0 : i32, i32
  }
  func.func @transform_2(%arg0: i32) -> (i32, i32) {
    %c0_i32 = arith.constant 0 : i32
    %c0_i32_0 = arith.constant 0 : i32
    %c0_i32_1 = arith.constant 0 : i32
    return %c0_i32, %c0_i32_0 : i32, i32
  }
  func.func @transform_3(%arg0: i32) -> (i32, i32) {
    %c0_i32 = arith.constant 0 : i32
    %c0_i32_0 = arith.constant 0 : i32
    %c0_i32_1 = arith.constant 0 : i32
    return %c0_i32, %c0_i32_0 : i32, i32
  }
  func.func @transform_4(%arg0: i32) -> (i32, i32, i32) {
    %c0_i32 = arith.constant 0 : i32
    %c0_i32_0 = arith.constant 0 : i32
    %c0_i32_1 = arith.constant 0 : i32
    return %arg0, %c0_i32, %c0_i32_0 : i32, i32, i32
  }
}

</mosaic_0001>

<bundles_post_ra>
// kernel: graph_attention_layer.1
= control target key start
LH: loop header
LB: loop body
LE: loop exit
PB: predicated region body
PF: predicated region fallthrough
CT: control target
= control target key end

     0   :  { %9 = vsyncpa [#allocation3], 0  ;;  %s3509_s0 = inlined_call_operand.vmem [shape: f32[1,8,256], index: 0, kind: input, shape index: {}]   ;;  %s3510_s1 = inlined_call_operand.vmem [shape: f32[2,8], index: 1, kind: input, shape index: {}]   ;;  %s3511_s2 = inlined_call_operand.vmem [shape: s32[256,1], index: 2, kind: input, shape index: {}]   ;;  %s3512_s3 = inlined_call_operand.vmem [shape: s32[1,256], index: 3, kind: input, shape index: {}]   ;;  %s3513_s4 = inlined_call_operand.vmem [shape: f32[1,8,256], index: 4, kind: output, shape index: {}]  }
   0x1   :  { %s18_s17 = sshll.u32 %s3510_s1, 4  ;;  %s19_s17 = int_to_ptr.vmem [resolvable:$true] %s18_s17 }
   0x2   :  { %s1918_s18 = scalar_lea.vmem %s19_s17, 32  ;;  %p1923_p1 = scmp.lt.s32.totalorder %s19_s17, %s19_s17 }
   0x3   :  { %p1919_p0 = scmp.ne.s32.totalorder %s19_s17, %s1918_s18  ;;  %p1924_p2 = scmp.lt.s32.totalorder %s1918_s18, %s1918_s18 }
   0x5   :  { %p1925_p3 = por %p1924_p2, %p1923_p1 }
   0x7   :  { %p1926_p4 = pnand %p1925_p3, %p1919_p0 }
   0x9   :  { %1929 = shalt.err (!%p1926_p4)
}
   0xa   :  { %s1932_s19 = smov [#allocation2]  }
   0xb   :  { %21 = dma.vmem_to_smem %s19_s17, 32, %s1932_s19, [#allocation3]  }
   0xc   :  { %1930 = dma.done.wait [#allocation3], 32  }
   0xd   :  { %1931 = vsyncadd [#allocation3], 4294967264 }
   0xe   :  { %29 = sfence }
   0xf   :  { %v747_v0 = vld [vmem:[%s3511_s2 + $0x78] sm:$0xff]  ;;  %s1965_s22 = sld [smem:[#allocation2 + $0x80]]  ;;  %v1933_v1 = vmov 0   ;;  %v1971_v2 = vld [vmem:[%s3509_s0 + $0x8] sm:$0xff]  ;;  %v746_v3 = vld [vmem:[%s3511_s2 + $0x70] sm:$0xff] }
  0x10   :  { %1715 = vset.pattern.permute.xlu1 %v1933_v1  ;;  %1669 = vmatprep.mubr.f32.mxu0 %v1971_v2  ;;  %s1974_s24 = sld [smem:[#allocation2 + $0x81]]  ;;  %v1984_v4 = vld [vmem:[%s3509_s0] sm:$0xff]  ;;  %v745_v6 = vld [vmem:[%s3511_s2 + $0x68] sm:$0xff]  ;;  %v743_v19 = vld [vmem:[%s3511_s2 + $0x58] sm:$0xff] }
  0x11   :  { %811 = vperm.xlu1 %1715, %v747_v0   ;;  %s1979_s27 = sld [smem:[#allocation2 + $0x82]]  ;;  %v744_v11 = vld [vmem:[%s3511_s2 + $0x60] sm:$0xff]  ;;  %v742_v28 = vld [vmem:[%s3511_s2 + $0x50] sm:$0xff]  ;;  %v741_v36 = vld [vmem:[%s3511_s2 + $0x48] sm:$0xff] }
  0x12   :  { %s1987_s30 = sld [smem:[#allocation2 + $0x83]]  ;;  %v739_v40 = vld [vmem:[%s3511_s2 + $0x38] sm:$0xff]  ;;  %v738_v41 = vld [vmem:[%s3511_s2 + $0x30] sm:$0xff]  ;;  %v737_v42 = vld [vmem:[%s3511_s2 + $0x28] sm:$0xff] }
  0x13   :  { %s1993_s7 = sld [smem:[#allocation2 + $0x84]]  ;;  %v736_v43 = vld [vmem:[%s3511_s2 + $0x20] sm:$0xff]  ;;  %v735_v44 = vld [vmem:[%s3511_s2 + $0x18] sm:$0xff]  ;;  %v734_v45 = vld [vmem:[%s3511_s2 + $0x10] sm:$0xff] }
  0x14   :  { %s1998_s8 = sld [smem:[#allocation2 + $0x85]]  ;;  %v733_v46 = vld [vmem:[%s3511_s2 + $0x8] sm:$0xff]  ;;  %v732_v48 = vld [vmem:[%s3511_s2] sm:$0xff]  ;;  %v763_v52 = vld [vmem:[%s3511_s2 + $0xf8] sm:$0xff] }
  0x15   :  { %808 = vperm.xlu1 %1715, %v746_v3   ;;  %v37_v5 = vstv %s1965_s22  ;;  %s2005_s11 = sld [smem:[#allocation2 + $0x86]]  ;;  %v762_v56 = vld [vmem:[%s3511_s2 + $0xf0] sm:$0xff] }
  0x16   :  { %v53_v7 = vstv %s1974_s24  ;;  %v38_v8 = vmul.f32 %v37_v5, %v1984_v4  ;;  %s2009_s12 = sld [smem:[#allocation2 + $0x87]]  ;;  %v39_v49 = vmul.f32 %v37_v5, %v1971_v2 }
  0x17   :  { %v54_v9 = vmul.f32 %v53_v7, %v1984_v4  ;;  %v77_v10 = vstv %s1979_s27  ;;  %v55_v47 = vmul.f32 %v53_v7, %v1971_v2  ;;  %s1696_s13 = sld [smem:[#allocation2 + $0x1]] }
  0x18   :  { %v78_v13 = vmul.f32 %v77_v10, %v1984_v4  ;;  %v101_v14 = vstv %s1987_s30  ;;  %v79_v51 = vmul.f32 %v77_v10, %v1971_v2  ;;  %s32_s14 = sld [smem:[#allocation2]] }
  0x19   :  { %805 = vperm.xlu1 %1715, %v745_v6   ;;  %v58_v12 = vrot.slane %v54_v9, 1  ;;  %v102_v17 = vmul.f32 %v101_v14, %v1984_v4  ;;  %v125_v18 = vstv %s1993_s7  ;;  %v59_v50 = vrot.slane %v55_v47, 1  ;;  %s1698_s15 = sld [smem:[#allocation2 + $0x2]] }
  0x1a   :  { %v82_v16 = vrot.slane %v78_v13, 2  ;;  %v126_v22 = vmul.f32 %v125_v18, %v1984_v4  ;;  %v149_v23 = vstv %s1998_s8  ;;  %v83_v54 = vrot.slane %v79_v51, 2  ;;  %s1700_s16 = sld [smem:[#allocation2 + $0x3]] }
  0x1b   :  { %v62_v15 = vadd.f32 %v58_v12, %v38_v8  ;;  %v106_v21 = vrot.slane %v102_v17, 3  ;;  %v150_v26 = vmul.f32 %v149_v23, %v1984_v4  ;;  %v173_v27 = vstv %s2005_s11  ;;  %s1702_s17 = sld [smem:[#allocation2 + $0x4]] }
  0x1c   :  { %v130_v25 = vrot.slane %v126_v22, 4  ;;  %v174_v31 = vmul.f32 %v173_v27, %v1984_v4  ;;  %v197_v32 = vstv %s2009_s12  ;;  %v63_v53 = vadd.f32 %v59_v50, %v39_v49  ;;  %s2162_s18 = sld [smem:[#allocation2 + $0x5]] }
  0x1d   :  { %802 = vperm.xlu1 %1715, %v744_v11   ;;  %v86_v20 = vadd.f32 %v82_v16, %v62_v15  ;;  %v154_v30 = vrot.slane %v150_v26, 5  ;;  %v198_v35 = vmul.f32 %v197_v32, %v1984_v4  ;;  %v103_v55 = vmul.f32 %v101_v14, %v1971_v2  ;;  %s2168_s19 = sld [smem:[#allocation2 + $0x6]] }
  0x1e   :  { %v178_v34 = vrot.slane %v174_v31, 6  ;;  %v87_v57 = vadd.f32 %v83_v54, %v63_v53  ;;  %v127_v59 = vmul.f32 %v125_v18, %v1971_v2  ;;  %v151_v62 = vmul.f32 %v149_v23, %v1971_v2  ;;  %v758_v23 = vld [vmem:[%s3511_s2 + $0xd0] sm:$0xff]  ;;  %s1708_s20 = sld [smem:[#allocation2 + $0x7]] }
  0x1f   :  { %v110_v24 = vadd.f32 %v106_v21, %v86_v20  ;;  %v202_v38 = vrot.slane %v198_v35, 7  ;;  %v107_v58 = vrot.slane %v103_v55, 3  ;;  %v175_v3 = vmul.f32 %v173_v27, %v1971_v2  ;;  %v759_v21 = vld [vmem:[%s3511_s2 + $0xd8] sm:$0xff]  ;;  %v756_v27 = vld [vmem:[%s3511_s2 + $0xc0] sm:$0xff]  ;;  %v754_v31 = vld [vmem:[%s3511_s2 + $0xb0] sm:$0xff] }
  0x20   :  { %v131_v61 = vrot.slane %v127_v59, 4  ;;  %v155_v0 = vrot.slane %v151_v62, 5  ;;  %v199_v7 = vmul.f32 %v197_v32, %v1971_v2 }
  0x21   :  { %799 = vperm.xlu1 %1715, %v743_v19   ;;  %v134_v29 = vadd.f32 %v130_v25, %v110_v24  ;;  %v111_v60 = vadd.f32 %v107_v58, %v87_v57  ;;  %v179_v6 = vrot.slane %v175_v3, 6  ;;  %v757_v25 = vld [vmem:[%s3511_s2 + $0xc8] sm:$0xff] }
  0x22   :  { %v203_v9 = vrot.slane %v199_v7, 7  ;;  %v761_v7 = vld [vmem:[%s3511_s2 + $0xe8] sm:$0xff] }
  0x23   :  { %v158_v33 = vadd.f32 %v154_v30, %v134_v29  ;;  %v135_v63 = vadd.f32 %v131_v61, %v111_v60  ;;  %v755_v29 = vld [vmem:[%s3511_s2 + $0xb8] sm:$0xff] }
  0x25   :  { %796 = vperm.xlu1 %1715, %v742_v28   ;;  %v182_v37 = vadd.f32 %v178_v34, %v158_v33  ;;  %v159_v5 = vadd.f32 %v155_v0, %v135_v63  ;;  %v753_v34 = vld [vmem:[%s3511_s2 + $0xa8] sm:$0xff] }
  0x27   :  { %v206_v39 = vadd.f32 %v202_v38, %v182_v37  ;;  %v183_v8 = vadd.f32 %v179_v6, %v159_v5 }
  0x29   :  { %793 = vperm.xlu1 %1715, %v741_v36   ;;  %208 = vxpose.xlu0.b32.start.end [1/1] (short) %v206_v39, 128  ;;  %v207_v10 = vadd.f32 %v203_v9, %v183_v8  ;;  %v752_v36 = vld [vmem:[%s3511_s2 + $0xa0] sm:$0xff]  ;;  %v751_v39 = vld [vmem:[%s3511_s2 + $0x98] sm:$0xff] }
  0x2a   :  { %v760_v9 = vld [vmem:[%s3511_s2 + $0xe0] sm:$0xff] }
  0x2d   :  { %787 = vperm.xlu1 %1715, %v739_v40  }
  0x31   :  { %784 = vperm.xlu1 %1715, %v738_v41  }
  0x35   :  { %781 = vperm.xlu1 %1715, %v737_v42   ;;  %v750_v42 = vld [vmem:[%s3511_s2 + $0x90] sm:$0xff] }
  0x39   :  { %778 = vperm.xlu1 %1715, %v736_v43  }
  0x3d   :  { %775 = vperm.xlu1 %1715, %v735_v44   ;;  %v748_v44 = vld [vmem:[%s3511_s2 + $0x80] sm:$0xff] }
  0x41   :  { %772 = vperm.xlu1 %1715, %v734_v45  }
  0x45   :  { %769 = vperm.xlu1 %1715, %v733_v46  }
  0x49   :  { %766 = vperm.xlu1 %1715, %v732_v48  }
  0x4d   :  { %859 = vperm.xlu1 %1715, %v763_v52  }
  0x51   :  { %856 = vperm.xlu1 %1715, %v762_v56  }
  0x66   :  { %240 = vxpose.xlu0.b32.start.end [1/1] (short) %v207_v10, 128 }
  0x8c   :  { %v2087_v33 = vpop.permute.xlu1 %811 }
  0x8f   :  { %1716 = vset.pattern.permute.xlu0 %v1933_v1  ;;  %v740_v1 = vld [vmem:[%s3511_s2 + $0x40] sm:$0xff] }
  0x90   :  { %v2097_v37 = vpop.permute.xlu1 %808 }
  0x94   :  { %v2106_v41 = vpop.permute.xlu1 %805 }
  0x98   :  { %v2116_v45 = vpop.permute.xlu1 %802 }
  0x9c   :  { %v2120_v48 = vpop.permute.xlu1 %799 }
  0xa0   :  { %v2122_v50 = vpop.permute.xlu1 %796 }
  0xa4   :  { %v2124_v53 = vpop.permute.xlu1 %793 }
  0xa5   :  { %v224_v11 = vpop.trf.xlu0 }
  0xa6   :  { %274 = vperm.xlu1 %1715, %v224_v11  }
  0xa8   :  { %v2126_v55 = vpop.permute.xlu1 %787 }
  0xa9   :  { %v225_v12 = vpop.trf.xlu0 }
  0xaa   :  { %279 = vperm.xlu1 %1715, %v225_v12  }
  0xac   :  { %v2128_v58 = vpop.permute.xlu1 %784 }
  0xad   :  { %v226_v13 = vpop.trf.xlu0 }
  0xae   :  { %284 = vperm.xlu1 %1715, %v226_v13   ;;  %v41_v13 = vstv %s1696_s13 }
  0xb0   :  { %v2130_v60 = vpop.permute.xlu1 %781 }
  0xb1   :  { %v227_v14 = vpop.trf.xlu0 }
  0xb2   :  { %289 = vperm.xlu1 %1715, %v227_v14  }
  0xb4   :  { %v2132_v61 = vpop.permute.xlu1 %778 }
  0xb5   :  { %v228_v15 = vpop.trf.xlu0 }
  0xb6   :  { %294 = vperm.xlu1 %1715, %v228_v15   ;;  %v42_v15 = vmul.f32 %v41_v13, %v1984_v4 }
  0xb8   :  { %v2134_v63 = vpop.permute.xlu1 %775 }
  0xb9   :  { %v229_v16 = vpop.trf.xlu0 }
  0xba   :  { %299 = vperm.xlu1 %1715, %v229_v16   ;;  %v33_v16 = vstv %s32_s14 }
  0xbc   :  { %v2136_v3 = vpop.permute.xlu1 %772 }
  0xbd   :  { %v230_v17 = vpop.trf.xlu0 }
  0xbe   :  { %304 = vperm.xlu1 %1715, %v230_v17   ;;  %v65_v17 = vstv %s1698_s15 }
  0xc0   :  { %v2138_v6 = vpop.permute.xlu1 %769 }
  0xc1   :  { %v231_v18 = vpop.trf.xlu0 }
  0xc2   :  { %309 = vperm.xlu1 %1715, %v231_v18   ;;  %v43_v18 = vmul.f32 %v41_v13, %v1971_v2 }
  0xc4   :  { %v2143_v8 = vpop.permute.xlu1 %766 }
  0xc5   :  { %v232_v19 = vpop.trf.xlu0 }
  0xc6   :  { %314 = vperm.xlu1 %1715, %v232_v19   ;;  %v46_v19 = vrot.slane %v42_v15, 1 }
  0xc8   :  { %v2148_v10 = vpop.permute.xlu1 %859 }
  0xc9   :  { %v233_v20 = vpop.trf.xlu0  ;;  %3566 = vst [vmem:[#allocation5_spill] sm:$0xff] %v2148_v10 }
  0xca   :  { %319 = vperm.xlu1 %1715, %v233_v20   ;;  %v34_v20 = vmul.f32 %v33_v16, %v1984_v4 }
  0xcb   :  { %790 = vperm.xlu0 %1716, %v740_v1   ;;  %v66_v1 = vmul.f32 %v65_v17, %v1984_v4 }
  0xcc   :  { %v2150_v11 = vpop.permute.xlu1 %856 }
  0xcd   :  { %v234_v22 = vpop.trf.xlu0  ;;  %3567 = vst [vmem:[#allocation6_spill] sm:$0xff] %v2150_v11 }
  0xce   :  { %324 = vperm.xlu1 %1715, %v234_v22   ;;  %v89_v22 = vstv %s1700_s16 }
  0xcf   :  { %847 = vperm.xlu0 %1716, %v759_v21  }
  0xd1   :  { %v235_v24 = vpop.trf.xlu0 }
  0xd2   :  { %329 = vperm.xlu1 %1715, %v235_v24   ;;  %v47_v24 = vrot.slane %v43_v18, 1 }
  0xd3   :  { %844 = vperm.xlu0 %1716, %v758_v23   ;;  %v35_v23 = vmul.f32 %v33_v16, %v1971_v2 }
  0xd5   :  { %v236_v26 = vpop.trf.xlu0 }
  0xd7   :  { %841 = vperm.xlu0 %1716, %v757_v25   ;;  %v67_v25 = vmul.f32 %v65_v17, %v1971_v2 }
  0xd9   :  { %v237_v28 = vpop.trf.xlu0 }
  0xdb   :  { %838 = vperm.xlu0 %1716, %v756_v27   ;;  %v90_v27 = vmul.f32 %v89_v22, %v1984_v4 }
  0xdd   :  { %v238_v30 = vpop.trf.xlu0 }
  0xdf   :  { %835 = vperm.xlu0 %1716, %v755_v29   ;;  %v113_v29 = vstv %s1702_s17 }
  0xe1   :  { %v239_v32 = vpop.trf.xlu0 }
  0xe3   :  { %832 = vperm.xlu0 %1716, %v754_v31   ;;  %v51_v31 = vadd.f32 %v47_v24, %v35_v23 }
  0xe5   :  { %v2092_v35 = vpop.trf.xlu0 }
  0xe7   :  { %829 = vperm.xlu0 %1716, %v753_v34   ;;  %v91_v34 = vmul.f32 %v89_v22, %v1971_v2 }
  0xe9   :  { %v2099_v38 = vpop.trf.xlu0 }
  0xeb   :  { %826 = vperm.xlu0 %1716, %v752_v36   ;;  %v94_v36 = vrot.slane %v90_v27, 3 }
  0xed   :  { %v2104_v40 = vpop.trf.xlu0 }
  0xef   :  { %823 = vperm.xlu0 %1716, %v751_v39   ;;  %v114_v39 = vmul.f32 %v113_v29, %v1984_v4 }
  0xf1   :  { %v2111_v43 = vpop.trf.xlu0 }
  0xf3   :  { %820 = vperm.xlu0 %1716, %v750_v42  }
  0xf5   :  { %v2118_v46 = vpop.trf.xlu0 }
  0xf7   :  { %814 = vperm.xlu0 %1716, %v748_v44   ;;  %v137_v44 = vstv %s2162_s18 }
  0xf9   :  { %v261_v47 = vpop.trf.xlu0 }
  0xfd   :  { %v262_v49 = vpop.trf.xlu0 }
 0x101   :  { %v263_v51 = vpop.trf.xlu0 }
 0x105   :  { %v264_v52 = vpop.trf.xlu0 }
 0x109   :  { %v265_v54 = vpop.trf.xlu0 }
 0x10d   :  { %v266_v56 = vpop.trf.xlu0 }
 0x111   :  { %v267_v57 = vpop.trf.xlu0 }
 0x112   :  { %409 = vperm.xlu1 %1715, %v267_v57   ;;  %v161_v57 = vstv %s2168_s19 }
 0x113   :  { %v163_v16 = vmul.f32 %v161_v57, %v1971_v2 }
 0x115   :  { %v268_v59 = vpop.trf.xlu0  ;;  %v167_v22 = vrot.slane %v163_v16, 6 }
 0x116   :  { %334 = vperm.xlu1 %1715, %v236_v26   ;;  %v70_v26 = vrot.slane %v66_v1, 2  ;;  %v432_v1 = vlaneseq }
 0x118   :  { %v2196_v27 = vshrl.u32 %v432_v1, 7 }
 0x119   :  { %v269_v62 = vpop.trf.xlu0 }
 0x11a   :  { %414 = vperm.xlu1 %1715, %v268_v59  }
 0x11d   :  { %v270_v0 = vpop.trf.xlu0 }
 0x11e   :  { %339 = vperm.xlu1 %1715, %v237_v28   ;;  %v50_v28 = vadd.f32 %v46_v19, %v34_v20 }
 0x120   :  { %v74_v42 = vadd.f32 %v70_v26, %v50_v28 }
 0x121   :  { %v271_v5 = vpop.trf.xlu0  ;;  %v2152_v12 = vpop.permute.xlu1 %274 }
 0x122   :  { %419 = vperm.xlu1 %1715, %v269_v62   ;;  %v139_v62 = vmul.f32 %v137_v44, %v1971_v2 }
 0x124   :  { %v143_v15 = vrot.slane %v139_v62, 5  ;;  %v2233_v62 = vadd.s32 24, %v2196_v27 }
 0x125   :  { %v2154_v14 = vpop.permute.xlu1 %279 }
 0x126   :  { %344 = vperm.xlu1 %1715, %v238_v30  }
 0x129   :  { %v2160_v21 = vpop.permute.xlu1 %284 }
 0x12a   :  { %424 = vperm.xlu1 %1715, %v270_v0  }
 0x12d   :  { %v2170_v30 = vpop.permute.xlu1 %289 }
 0x12e   :  { %349 = vperm.xlu1 %1715, %v239_v32   ;;  %v71_v32 = vrot.slane %v67_v25, 2 }
 0x132   :  { %429 = vperm.xlu1 %1715, %v271_v5   ;;  %v162_v5 = vmul.f32 %v161_v57, %v1984_v4 }
 0x134   :  { %v166_v17 = vrot.slane %v162_v5, 6 }
 0x136   :  { %853 = vperm.xlu1 %1715, %v761_v7  }
 0x13a   :  { %404 = vperm.xlu1 %1715, %v266_v56   ;;  %v2179_v56 = vpop.permute.xlu1 %294 }
 0x13e   :  { %850 = vperm.xlu1 %1715, %v760_v9   ;;  %v185_v9 = vstv %s1708_s20  ;;  %v2185_v13 = vpop.permute.xlu1 %299 }
 0x13f   :  { %v186_v18 = vmul.f32 %v185_v9, %v1984_v4  ;;  %v187_v23 = vmul.f32 %v185_v9, %v1971_v2 }
 0x141   :  { %v190_v24 = vrot.slane %v186_v18, 7  ;;  %v191_v28 = vrot.slane %v187_v23, 7  ;;  %v2271_v23 = vadd.s32 64, %v2196_v27 }
 0x142   :  { %399 = vperm.xlu1 %1715, %v265_v54   ;;  %v98_v54 = vadd.f32 %v94_v36, %v74_v42  ;;  %v2194_v26 = vpop.permute.xlu1 %304  ;;  %v867_v42 = vsub.s32 1, %v2196_v27 }
 0x146   :  { %394 = vperm.xlu1 %1715, %v264_v52   ;;  %v138_v52 = vmul.f32 %v137_v44, %v1984_v4  ;;  %v764_v44 = vld [vmem:[%s3512_s3] sm:$0x3] }
 0x147   :  { %v2224_v57 = vrot.slane %v764_v44, %v867_v42 }
 0x148   :  { %v142_v0 = vrot.slane %v138_v52, 5  ;;  %v2220_v52 = vadd.s32 8, %v2196_v27 }
 0x149   :  { %vm872_vm5 = vcmp.eq.s32.totalorder %v2138_v6, %v2224_v57  ;;  %vm870_vm8 = vcmp.eq.s32.totalorder %v2143_v8, %v2224_v57  ;;  %vm874_vm12 = vcmp.eq.s32.totalorder %v2136_v3, %v2224_v57  ;;  %vm876_vm15 = vcmp.eq.s32.totalorder %v2134_v63, %v2224_v57 }
 0x14a   :  { %389 = vperm.xlu1 %1715, %v263_v51   ;;  %v118_v51 = vrot.slane %v114_v39, 4 }
 0x14c   :  { %v122_v7 = vadd.f32 %v118_v51, %v98_v54 }
 0x14e   :  { %384 = vperm.xlu1 %1715, %v262_v49   ;;  %v115_v49 = vmul.f32 %v113_v29, %v1971_v2  ;;  %v146_v19 = vadd.f32 %v142_v0, %v122_v7  ;;  %v434_v29 = vsub.s32 0, %v2196_v27  ;;  %v2236_v0 = vadd.s32 16, %v2196_v27 }
 0x14f   :  { %v2239_v7 = vadd.s32 32, %v2196_v27 }
 0x150   :  { %v119_v59 = vrot.slane %v115_v49, 4  ;;  %v170_v25 = vadd.f32 %v166_v17, %v146_v19  ;;  %v2222_v54 = vrot.slane %v764_v44, %v434_v29 }
 0x152   :  { %379 = vperm.xlu1 %1715, %v261_v47   ;;  %v95_v47 = vrot.slane %v91_v34, 3  ;;  %v194_v4 = vadd.f32 %v190_v24, %v170_v25  ;;  %vm871_vm4 = vcmp.eq.s32.totalorder %v2138_v6, %v2222_v54  ;;  %vm869_vm7 = vcmp.eq.s32.totalorder %v2143_v8, %v2222_v54 }
 0x153   :  { %vm873_vm10 = vcmp.eq.s32.totalorder %v2136_v3, %v2222_v54  ;;  %v2274_v24 = vadd.s32 88, %v2196_v27  ;;  %v2277_v25 = vadd.s32 72, %v2196_v27  ;;  %vm875_vm11 = vcmp.eq.s32.totalorder %v2134_v63, %v2222_v54 }
 0x154   :  { %v2201_v34 = vrot.slane %v194_v4, %v434_v29 }
 0x156   :  { %374 = vperm.xlu1 %1715, %v2118_v46   ;;  %v75_v46 = vadd.f32 %v71_v32, %v51_v31  ;;  %v2199_v31 = vpop.permute.xlu1 %309  ;;  %v440_v2 = vadd.f32 %v2201_v34, %v2152_v12  ;;  %v442_v51 = vadd.f32 %v2201_v34, %v2154_v14  ;;  %v444_v17 = vadd.f32 %v2201_v34, %v2160_v21 }
 0x157   :  { %v450_v10 = vadd.f32 %v2201_v34, %v2185_v13 }
 0x158   :  { %v568_v49 = vmul.f32 0.01, %v440_v2  ;;  %vm504_vm0 = vcmp.ge.f32.partialorder %v440_v2, 0.0  ;;  %v570_v5 = vmul.f32 0.01, %v442_v51  ;;  %vm506_vm6 = vcmp.ge.f32.partialorder %v442_v51, 0.0 }
 0x15a   :  { %369 = vperm.xlu1 %1715, %v2111_v43   ;;  %v99_v43 = vadd.f32 %v95_v47, %v75_v46  ;;  %v2207_v39 = vpop.permute.xlu1 %314  ;;  %v2213_v46 = vand.u32 127, %v432_v1  ;;  %v632_v9 = vsel %vm504_vm0, %v440_v2, %v568_v49  ;;  %v446_v1 = vadd.f32 %v2201_v34, %v2170_v30 }
 0x15b   :  { %v997_v19 = vsel %vm869_vm7, %v632_v9, -1e+30  ;;  %vm508_vm0 = vcmp.ge.f32.partialorder %v444_v17, 0.0  ;;  %v2317_v49 = vadd.s32 104, %v2196_v27  ;;  %v2329_v9 = vadd.s32 112, %v2196_v27 }
 0x15c   :  { %vm933_vm1 = vcmp.eq.s32.totalorder %v2196_v27, %v2213_v46  ;;  %vm935_vm3 = vcmp.eq.s32.totalorder %v2220_v52, %v2213_v46  ;;  %v2292_v4 = vadd.s32 128, %v2213_v46  ;;  %vm937_vm13 = vcmp.eq.s32.totalorder %v2236_v0, %v2213_v46 }
 0x15d   :  { %vm939_vm14 = vcmp.eq.s32.totalorder %v2233_v62, %v2213_v46  ;;  %v2310_v42 = vsel %vm933_vm1, 0.0, %v997_v19  ;;  %v574_v44 = vmul.f32 0.01, %v446_v1  ;;  %vm877_vm1 = vcmp.eq.s32.totalorder %v2132_v61, %v2222_v54 }
 0x15e   :  { %364 = vperm.xlu1 %1715, %v2104_v40   ;;  %v123_v40 = vadd.f32 %v119_v59, %v99_v43  ;;  %v2226_v43 = vpop.permute.xlu1 %319  ;;  %3570 = vst [vmem:[#allocation9_spill] sm:$0xff] %v2310_v42  ;;  %v452_v52 = vadd.f32 %v2201_v34, %v2194_v26 }
 0x160   :  { %v147_v20 = vadd.f32 %v143_v15, %v123_v40  ;;  %v2255_v40 = vadd.s32 56, %v2196_v27  ;;  %v2258_v15 = vadd.s32 48, %v2196_v27 }
 0x162   :  { %359 = vperm.xlu1 %1715, %v2099_v38   ;;  %v749_v38 = vld [vmem:[%s3511_s2 + $0x88] sm:$0xff] }
 0x166   :  { %354 = vperm.xlu1 %1715, %v2092_v35   ;;  %v171_v35 = vadd.f32 %v167_v22, %v147_v20  ;;  %v2266_v20 = vpop.permute.xlu1 %324  ;;  %v634_v22 = vsel %vm506_vm6, %v442_v51, %v570_v5  ;;  %vm510_vm6 = vcmp.ge.f32.partialorder %v446_v1, 0.0  ;;  %v2320_v51 = vadd.s32 96, %v2196_v27 }
 0x167   :  { %v999_v2 = vsel %vm871_vm4, %v634_v22, -1e+30  ;;  %v638_v11 = vsel %vm510_vm6, %v446_v1, %v574_v44  ;;  %v454_v1 = vadd.f32 %v2201_v34, %v2199_v31 }
 0x168   :  { %v195_v32 = vadd.f32 %v191_v28, %v171_v35  ;;  %v2289_v28 = vadd.s32 216, %v2196_v27 }
 0x16a   :  { %817 = vperm.xlu1 %1715, %v749_v38   ;;  %v2203_v36 = vrot.slane %v195_v32, %v434_v29  ;;  %3568 = vst [vmem:[#allocation7_spill] sm:$0xff] %v2289_v28  ;;  %v572_v32 = vmul.f32 0.01, %v444_v17  ;;  %v2326_v5 = vpop.permute.xlu1 %329 }
 0x16c   :  { %v441_v47 = vadd.f32 %v2203_v36, %v2152_v12  ;;  %v443_v12 = vadd.f32 %v2203_v36, %v2154_v14  ;;  %v2248_v14 = vadd.s32 40, %v2196_v27  ;;  %v445_v38 = vadd.f32 %v2203_v36, %v2160_v21 }
 0x16d   :  { %v2280_v21 = vadd.s32 80, %v2196_v27  ;;  %v447_v35 = vadd.f32 %v2203_v36, %v2170_v30  ;;  %v636_v19 = vsel %vm508_vm0, %v444_v17, %v572_v32  ;;  %v2355_v17 = vadd.s32 240, %v2196_v27 }
 0x16e   :  { %v569_v59 = vmul.f32 0.01, %v441_v47  ;;  %vm505_vm2 = vcmp.ge.f32.partialorder %v441_v47, 0.0  ;;  %v571_v16 = vmul.f32 0.01, %v443_v12  ;;  %vm507_vm9 = vcmp.ge.f32.partialorder %v443_v12, 0.0 }
 0x16f   :  { %v573_v8 = vmul.f32 0.01, %v445_v38  ;;  %vm511_vm4 = vcmp.ge.f32.partialorder %v447_v35, 0.0  ;;  %3573 = vst [vmem:[#allocation12_spill] sm:$0xff] %v2355_v17  ;;  %v451_v44 = vadd.f32 %v2203_v36, %v2185_v13  ;;  %v580_v13 = vmul.f32 0.01, %v452_v52 }
 0x170   :  { %v633_v18 = vsel %vm505_vm2, %v441_v47, %v569_v59  ;;  %v635_v30 = vsel %vm507_vm9, %v443_v12, %v571_v16  ;;  %v448_v47 = vadd.f32 %v2201_v34, %v2179_v56  ;;  %vm509_vm2 = vcmp.ge.f32.partialorder %v445_v38, 0.0 }
 0x171   :  { %v2299_v29 = vsel %vm870_vm8, %v633_v18, -1e+30  ;;  %v575_v59 = vmul.f32 0.01, %v447_v35  ;;  %v449_v12 = vadd.f32 %v2203_v36, %v2179_v56  ;;  %v2334_v16 = vsel %vm872_vm5, %v635_v30, -1e+30 }
 0x172   :  { %3569 = vst [vmem:[#allocation8_spill] sm:$0xff] %v2299_v29  ;;  %3571 = vst [vmem:[#allocation10_spill] sm:$0xff] %v2334_v16  ;;  %v2339_v18 = vsel %vm935_vm3, 0.0, %v999_v2  ;;  %v576_v22 = vmul.f32 0.01, %v448_v47  ;;  %vm941_vm5 = vcmp.eq.s32.totalorder %v2239_v7, %v2213_v46  ;;  %v637_v6 = vsel %vm509_vm2, %v445_v38, %v573_v8 }
 0x173   :  { %3572 = vst [vmem:[#allocation11_spill] sm:$0xff] %v2339_v18  ;;  %vm512_vm7 = vcmp.ge.f32.partialorder %v448_v47, 0.0  ;;  %v2352_v30 = vadd.s32 120, %v2196_v27  ;;  %vm878_vm3 = vcmp.eq.s32.totalorder %v2132_v61, %v2224_v57  ;;  %v577_v32 = vmul.f32 0.01, %v449_v12 }
 0x174   :  { %v639_v38 = vsel %vm511_vm4, %v447_v35, %v575_v59  ;;  %v1001_v8 = vsel %vm873_vm10, %v636_v19, -1e+30  ;;  %vm881_vm8 = vcmp.eq.s32.totalorder %v2128_v58, %v2222_v54  ;;  %vm879_vm9 = vcmp.eq.s32.totalorder %v2130_v60, %v2222_v54 }
 0x175   :  { %vm513_vm0 = vcmp.ge.f32.partialorder %v449_v12, 0.0  ;;  %v1003_v56 = vsel %vm875_vm11, %v638_v11, -1e+30  ;;  %v2379_v35 = vsel %vm874_vm12, %v637_v6, -1e+30  ;;  %vm883_vm10 = vcmp.eq.s32.totalorder %v2126_v55, %v2222_v54 }
 0x176   :  { %3574 = vst [vmem:[#allocation13_spill] sm:$0xff] %v2379_v35  ;;  %v578_v59 = vmul.f32 0.01, %v450_v10  ;;  %v453_v19 = vadd.f32 %v2203_v36, %v2194_v26  ;;  %v455_v29 = vadd.f32 %v2203_v36, %v2199_v31  ;;  %v640_v11 = vsel %vm512_vm7, %v448_v47, %v576_v22 }
 0x177   :  { %vm514_vm11 = vcmp.ge.f32.partialorder %v450_v10, 0.0  ;;  %v2397_v3 = vsel %vm876_vm15, %v639_v38, -1e+30  ;;  %v2402_v26 = vsel %vm937_vm13, 0.0, %v1001_v8  ;;  %vm880_vm4 = vcmp.eq.s32.totalorder %v2130_v60, %v2224_v57 }
 0x178   :  { %3575 = vst [vmem:[#allocation14_spill] sm:$0xff] %v2397_v3  ;;  %3576 = vst [vmem:[#allocation15_spill] sm:$0xff] %v2402_v26  ;;  %vm516_vm7 = vcmp.ge.f32.partialorder %v452_v52, 0.0  ;;  %v582_v31 = vmul.f32 0.01, %v454_v1  ;;  %v2411_v22 = vsel %vm939_vm14, 0.0, %v1003_v56  ;;  %v641_v63 = vsel %vm513_vm0, %v449_v12, %v577_v32 }
 0x179   :  { %3577 = vst [vmem:[#allocation16_spill] sm:$0xff] %v2411_v22  ;;  %vm882_vm15 = vcmp.eq.s32.totalorder %v2128_v58, %v2224_v57  ;;  %vm515_vm6 = vcmp.ge.f32.partialorder %v451_v44, 0.0  ;;  %v579_v0 = vmul.f32 0.01, %v451_v44  ;;  %vm518_vm13 = vcmp.ge.f32.partialorder %v454_v1, 0.0 }
 0x17a   :  { %vm884_vm12 = vcmp.eq.s32.totalorder %v2126_v55, %v2224_v57  ;;  %v1005_v6 = vsel %vm877_vm1, %v640_v11, -1e+30  ;;  %vm517_vm2 = vcmp.ge.f32.partialorder %v453_v19, 0.0  ;;  %v581_v38 = vmul.f32 0.01, %v453_v19 }
 0x17b   :  { %v583_v62 = vmul.f32 0.01, %v455_v29  ;;  %v642_v56 = vsel %vm514_vm11, %v450_v10, %v578_v59  ;;  %v456_v12 = vadd.f32 %v2201_v34, %v2207_v39  ;;  %v457_v32 = vadd.f32 %v2203_v36, %v2207_v39 }
 0x17c   :  { %vm519_vm14 = vcmp.ge.f32.partialorder %v455_v29, 0.0  ;;  %v644_v8 = vsel %vm516_vm7, %v452_v52, %v580_v13  ;;  %v2430_v17 = vadd.s32 232, %v2196_v27  ;;  %v646_v11 = vsel %vm518_vm13, %v454_v1, %v582_v31 }
 0x17d   :  { %v643_v59 = vsel %vm515_vm6, %v451_v44, %v579_v0  ;;  %v2442_v52 = vsel %vm878_vm3, %v641_v63, -1e+30  ;;  %v2447_v1 = vsel %vm941_vm5, 0.0, %v1005_v6  ;;  %v647_v13 = vsel %vm519_vm14, %v455_v29, %v583_v62  ;;  %v791_v6 = vpop.permute.xlu0 %790 }
 0x17e   :  { %3578 = vst [vmem:[#allocation17_spill] sm:$0xff] %v2442_v52  ;;  %3579 = vst [vmem:[#allocation18_spill] sm:$0xff] %v2447_v1  ;;  %v1007_v31 = vsel %vm879_vm9, %v642_v56, -1e+30  ;;  %v645_v44 = vsel %vm517_vm2, %v453_v19, %v581_v38  ;;  %v1009_v0 = vsel %vm881_vm8, %v644_v8, -1e+30  ;;  %v458_v63 = vadd.f32 %v2201_v34, %v2226_v43 }
 0x17f   :  { %v584_v10 = vmul.f32 0.01, %v456_v12  ;;  %v585_v61 = vmul.f32 0.01, %v457_v32  ;;  %v1011_v7 = vsel %vm883_vm10, %v646_v11, -1e+30  ;;  %v459_v29 = vadd.f32 %v2203_v36, %v2226_v43 }
 0x180   :  { %vm521_vm1 = vcmp.ge.f32.partialorder %v457_v32, 0.0  ;;  %vm520_vm5 = vcmp.ge.f32.partialorder %v456_v12, 0.0  ;;  %v2464_v38 = vadd.s32 248, %v2196_v27  ;;  %vm887_vm3 = vcmp.eq.s32.totalorder %v2124_v53, %v2222_v54 }
 0x181   :  { %v2469_v62 = vadd.s32 224, %v2196_v27  ;;  %v2474_v56 = vsel %vm880_vm4, %v643_v59, -1e+30  ;;  %vm3580_vm8 = vcmp.eq.s32.totalorder %v2248_v14, %v2213_v46  ;;  %v2486_v11 = vsel %vm884_vm12, %v647_v13, -1e+30 }
 0x182   :  { %v2479_v43 = vsel %vm3580_vm8, 0.0, %v1007_v31  ;;  %3581 = vst [vmem:[#allocation19_spill] sm:$0xff] %v2486_v11  ;;  %vm3582_vm9 = vcmp.eq.s32.totalorder %v2255_v40, %v2213_v46  ;;  %v2496_v60 = vsel %vm882_vm15, %v645_v44, -1e+30  ;;  %vm3584_vm0 = vcmp.eq.s32.totalorder %v2258_v15, %v2213_v46 }
 0x183   :  { %v2491_v28 = vsel %vm3582_vm9, 0.0, %v1011_v7  ;;  %v2501_v14 = vsel %vm3584_vm0, 0.0, %v1009_v0  ;;  %v586_v59 = vmul.f32 0.01, %v458_v63  ;;  %v649_v31 = vsel %vm521_vm1, %v457_v32, %v585_v61 }
 0x184   :  { %3583 = vst [vmem:[#allocation20_spill] sm:$0xff] %v2491_v28  ;;  %v648_v55 = vsel %vm520_vm5, %v456_v12, %v584_v10  ;;  %vm885_vm10 = vcmp.eq.s32.totalorder %v791_v6, %v2222_v54  ;;  %vm886_vm2 = vcmp.eq.s32.totalorder %v791_v6, %v2224_v57  ;;  %vm522_vm11 = vcmp.ge.f32.partialorder %v458_v63, 0.0 }
 0x185   :  { %v587_v58 = vmul.f32 0.01, %v459_v29  ;;  %vm897_vm12 = vcmp.eq.s32.totalorder %v2097_v37, %v2222_v54  ;;  %v462_v15 = vadd.f32 %v2201_v34, %v2326_v5  ;;  %vm898_vm6 = vcmp.eq.s32.totalorder %v2097_v37, %v2224_v57 }
 0x186   :  { %vm961_vm4 = vcmp.eq.s32.totalorder %v2329_v9, %v2213_v46  ;;  %vm523_vm7 = vcmp.ge.f32.partialorder %v459_v29, 0.0  ;;  %v2519_v32 = vadd.s32 208, %v2196_v27  ;;  %vm895_vm15 = vcmp.eq.s32.totalorder %v2106_v41, %v2222_v54 }
 0x187   :  { %v2525_v10 = vadd.f32 %v2201_v34, %v2266_v20  ;;  %v2531_v61 = vadd.s32 200, %v2196_v27  ;;  %vm891_vm13 = vcmp.eq.s32.totalorder %v2120_v48, %v2222_v54  ;;  %v2537_v7 = vsel %vm885_vm10, %v648_v55, -1e+30 }
 0x188   :  { %v2541_v8 = vsel %vm886_vm2, %v649_v31, -1e+30  ;;  %v2550_v0 = vadd.f32 %v2203_v36, %v2266_v20  ;;  %v463_v55 = vadd.f32 %v2203_v36, %v2326_v5  ;;  %v2555_v6 = vsel %vm523_vm7, %v459_v29, %v587_v58  ;;  %v2562_v20 = vpop.permute.xlu0 %847 }
 0x189   :  { %3585 = vst [vmem:[#allocation21_spill] sm:$0xff] %v2531_v61  ;;  %3586 = vst [vmem:[#allocation22_spill] sm:$0xff] %v2541_v8  ;;  %v590_v31 = vmul.f32 0.01, %v462_v15  ;;  %vm896_vm5 = vcmp.eq.s32.totalorder %v2106_v41, %v2224_v57  ;;  %vm526_vm9 = vcmp.ge.f32.partialorder %v462_v15, 0.0  ;;  %vm900_vm8 = vcmp.eq.s32.totalorder %v2087_v33, %v2224_v57 }
 0x18a   :  { %v591_v16 = vmul.f32 0.01, %v463_v55  ;;  %vm963_vm7 = vcmp.eq.s32.totalorder %v2352_v30, %v2213_v46  ;;  %vm951_vm14 = vcmp.eq.s32.totalorder %v2277_v25, %v2213_v46  ;;  %vm889_vm0 = vcmp.eq.s32.totalorder %v2122_v50, %v2222_v54 }
 0x18b   :  { %v654_v1 = vsel %vm526_vm9, %v462_v15, %v590_v31  ;;  %vm890_vm9 = vcmp.eq.s32.totalorder %v2122_v50, %v2224_v57 }
 0x18d   :  { %v2361_v2 = vpop.permute.xlu1 %409 }
 0x191   :  { %v2406_v47 = vpop.permute.xlu1 %334 }
 0x192   :  { %v464_v58 = vadd.f32 %v2201_v34, %v2406_v47 }
 0x194   :  { %v592_v37 = vmul.f32 0.01, %v464_v58 }
 0x195   :  { %v2427_v42 = vpop.permute.xlu1 %414 }
 0x199   :  { %v340_v19 = vpop.permute.xlu1 %339 }
 0x19a   :  { %v466_v40 = vadd.f32 %v2201_v34, %v340_v19  ;;  %v467_v44 = vadd.f32 %v2203_v36, %v340_v19  ;;  %v650_v19 = vsel %vm522_vm11, %v458_v63, %v586_v59  ;;  %vm527_vm11 = vcmp.ge.f32.partialorder %v463_v55, 0.0 }
 0x19b   :  { %v2567_v5 = vsel %vm887_vm3, %v650_v19, -1e+30 }
 0x19c   :  { %v594_v12 = vmul.f32 0.01, %v466_v40  ;;  %vm530_vm1 = vcmp.ge.f32.partialorder %v466_v40, 0.0  ;;  %v595_v59 = vmul.f32 0.01, %v467_v44  ;;  %vm531_vm3 = vcmp.ge.f32.partialorder %v467_v44, 0.0 }
 0x19d   :  { %v2506_v13 = vpop.permute.xlu1 %419 }
 0x19e   :  { %v658_v19 = vsel %vm530_vm1, %v466_v40, %v594_v12  ;;  %vm893_vm1 = vcmp.eq.s32.totalorder %v2116_v45, %v2222_v54  ;;  %v588_v40 = vmul.f32 0.01, %v2525_v10  ;;  %v2596_v12 = vpop.permute.xlu0 %844 }
 0x1a1   :  { %v345_v35 = vpop.permute.xlu1 %344 }
 0x1a2   :  { %v468_v26 = vadd.f32 %v2201_v34, %v345_v35  ;;  %v469_v63 = vadd.f32 %v2203_v36, %v345_v35 }
 0x1a4   :  { %v596_v29 = vmul.f32 0.01, %v468_v26  ;;  %vm532_vm10 = vcmp.ge.f32.partialorder %v468_v26, 0.0  ;;  %vm533_vm2 = vcmp.ge.f32.partialorder %v469_v63, 0.0  ;;  %v597_v35 = vmul.f32 0.01, %v469_v63 }
 0x1a5   :  { %v2577_v39 = vpop.permute.xlu1 %424 }
 0x1a6   :  { %v660_v18 = vsel %vm532_vm10, %v468_v26, %v596_v29  ;;  %v661_v52 = vsel %vm533_vm2, %v469_v63, %v597_v35  ;;  %v465_v26 = vadd.f32 %v2203_v36, %v2406_v47  ;;  %vm525_vm10 = vcmp.ge.f32.partialorder %v2550_v0, 0.0 }
 0x1a7   :  { %v1025_v15 = vsel %vm897_vm12, %v660_v18, -1e+30  ;;  %v2604_v31 = vsel %vm898_vm6, %v661_v52, -1e+30  ;;  %v589_v63 = vmul.f32 0.01, %v2550_v0  ;;  %v659_v47 = vsel %vm531_vm3, %v467_v44, %v595_v59 }
 0x1a8   :  { %3587 = vst [vmem:[#allocation23_spill] sm:$0xff] %v2604_v31  ;;  %v1023_v29 = vsel %vm895_vm15, %v658_v19, -1e+30  ;;  %vm888_vm6 = vcmp.eq.s32.totalorder %v2124_v53, %v2224_v57  ;;  %v2623_v52 = vsel %vm961_vm4, 0.0, %v1025_v15  ;;  %v655_v44 = vsel %vm527_vm11, %v463_v55, %v591_v16 }
 0x1a9   :  { %v350_v18 = vpop.permute.xlu1 %349  ;;  %3588 = vst [vmem:[#allocation24_spill] sm:$0xff] %v2623_v52  ;;  %v1019_v59 = vsel %vm891_vm13, %v654_v1, -1e+30  ;;  %vm894_vm15 = vcmp.eq.s32.totalorder %v2116_v45, %v2224_v57  ;;  %vm528_vm3 = vcmp.ge.f32.partialorder %v464_v58, 0.0  ;;  %v1167_v61 = vmax.f32 %v2623_v52, %v2604_v31  ;;  %v2648_v31 = vpop.permute.xlu0 %841 }
 0x1aa   :  { %v470_v35 = vadd.f32 %v2201_v34, %v350_v18  ;;  %v471_v19 = vadd.f32 %v2203_v36, %v350_v18  ;;  %v593_v9 = vmul.f32 0.01, %v465_v26  ;;  %v2638_v16 = vsel %vm896_vm5, %v659_v47, -1e+30 }
 0x1ab   :  { %vm3589_vm4 = vcmp.eq.s32.totalorder %v2317_v49, %v2213_v46  ;;  %vm3590_vm13 = vcmp.ge.f32.partialorder %v2525_v10, 0.0  ;;  %1168 = vmax.xlane.f32.xlu0 %v1167_v61  ;;  %vm529_vm12 = vcmp.ge.f32.partialorder %v465_v26, 0.0  ;;  %vm3591_vm5 = vcmp.eq.s32.totalorder %v2120_v48, %v2224_v57 }
 0x1ac   :  { %v2643_v1 = vsel %vm3589_vm4, 0.0, %v1023_v29  ;;  %v652_v55 = vsel %vm3590_vm13, %v2525_v10, %v588_v40  ;;  %vm534_vm11 = vcmp.ge.f32.partialorder %v470_v35, 0.0  ;;  %vm535_vm2 = vcmp.ge.f32.partialorder %v471_v19, 0.0 }
 0x1ad   :  { %v598_v15 = vmul.f32 0.01, %v470_v35  ;;  %v599_v18 = vmul.f32 0.01, %v471_v19  ;;  %v2650_v41 = vpop.permute.xlu1 %429  ;;  %v2655_v49 = vsel %vm3591_vm5, %v655_v44, -1e+30  ;;  %v656_v47 = vsel %vm528_vm3, %v464_v58, %v592_v37 }
 0x1ae   :  { %v653_v10 = vsel %vm525_vm10, %v2550_v0, %v589_v63  ;;  %v495_v40 = vadd.f32 %v2203_v36, %v2361_v2  ;;  %v1164_v29 = vmax.f32 %v2643_v1, %v2638_v16  ;;  %vm3592_vm4 = vcmp.eq.s32.totalorder %v2271_v23, %v2213_v46 }
 0x1af   :  { %v662_v61 = vsel %vm534_vm11, %v470_v35, %v598_v15  ;;  %v663_v52 = vsel %vm535_vm2, %v471_v19, %v599_v18  ;;  %v2669_v48 = vsel %vm3592_vm4, 0.0, %v2537_v7  ;;  %vm3594_vm3 = vcmp.eq.s32.totalorder %v2087_v33, %v2222_v54  ;;  %v2725_v19 = vpop.permute.xlu0 %838  ;;  %v3605_v15 = vld [vmem:[#allocation12_spill] sm:$0xff] }
 0x1b0   :  { %3593 = vst [vmem:[#allocation25_spill] sm:$0xff] %v2669_v48  ;;  %v1027_v58 = vsel %vm3594_vm3, %v662_v61, -1e+30  ;;  %v2677_v0 = vsel %vm900_vm8, %v663_v52, -1e+30  ;;  %vm3595_vm10 = vcmp.eq.s32.totalorder %v2274_v24, %v2213_v46  ;;  %v494_v37 = vadd.f32 %v2201_v34, %v2361_v2  ;;  %1165 = vmax.xlane.f32.xlu0 %v1164_v29  ;;  %v3596_v52 = vld [vmem:[#allocation7_spill] sm:$0xff] }
 0x1b1   :  { %v2682_v63 = vsel %vm3595_vm10, 0.0, %v1019_v59  ;;  %v657_v23 = vsel %vm529_vm12, %v465_v26, %v593_v9  ;;  %v1021_v7 = vsel %vm893_vm1, %v656_v47, -1e+30  ;;  %v1017_v33 = vsel %vm889_vm0, %v652_v55, -1e+30  ;;  %v2695_v24 = vpop.permute.xlu1 %853  ;;  %v3604_v9 = vld [vmem:[#allocation6_spill] sm:$0xff] }
 0x1b2   :  { %vm988_vm8 = vcmp.eq.s32.totalorder %v3596_v52, %v2292_v4  ;;  %v2700_v2 = vsel %vm963_vm7, 0.0, %v1027_v58  ;;  %v2706_v26 = vsel %vm888_vm6, %v2555_v6, -1e+30  ;;  %v2712_v44 = vsel %vm951_vm14, 0.0, %v2567_v5 }
 0x1b3   :  { %3597 = vst [vmem:[#allocation7_spill] sm:$0xff] %v2706_v26  ;;  %3598 = vst [vmem:[#allocation26_spill] sm:$0xff] %v2712_v44  ;;  %v2717_v59 = vsel %vm890_vm9, %v653_v10, -1e+30  ;;  %v623_v30 = vmul.f32 0.01, %v495_v40  ;;  %v501_v35 = vadd.f32 %v2203_v36, %v2577_v39  ;;  %v1170_v53 = vmax.f32 %v2700_v2, %v2677_v0 }
 0x1b4   :  { %3599 = vst [vmem:[#allocation27_spill] sm:$0xff] %v2717_v59  ;;  %v1158_v6 = vmax.f32 %v2682_v63, %v2655_v49  ;;  %vm559_vm0 = vcmp.ge.f32.partialorder %v495_v40, 0.0  ;;  %v2730_v25 = vsel %vm894_vm15, %v657_v23, -1e+30  ;;  %vm3601_vm14 = vcmp.eq.s32.totalorder %v2320_v51, %v2213_v46 }
 0x1b5   :  { %3600 = vst [vmem:[#allocation28_spill] sm:$0xff] %v2730_v25  ;;  %v2735_v50 = vsel %vm3601_vm14, 0.0, %v1021_v7  ;;  %vm3602_vm7 = vcmp.eq.s32.totalorder %v2280_v21, %v2213_v46  ;;  %vm930_vm1 = vcmp.eq.s32.totalorder %v3604_v9, %v2224_v57  ;;  %v622_v55 = vmul.f32 0.01, %v494_v37  ;;  %1171 = vmax.xlane.f32.xlu1 %v1170_v53  ;;  %v405_v21 = vpop.permute.xlu1 %404  ;;  %v3606_v53 = vld [vmem:[#allocation5_spill] sm:$0xff] }
 0x1b6   :  { %v2740_v5 = vsel %vm3602_vm7, 0.0, %v1017_v33  ;;  %vm923_vm9 = vcmp.eq.s32.totalorder %v2562_v20, %v2222_v54  ;;  %vm924_vm12 = vcmp.eq.s32.totalorder %v2562_v20, %v2224_v57  ;;  %1159 = vmax.xlane.f32.xlu0 %v1158_v6  ;;  %v2749_v45 = vadd.s32 184, %v2196_v27 }
 0x1b7   :  { %3603 = vst [vmem:[#allocation29_spill] sm:$0xff] %v2740_v5  ;;  %vm558_vm6 = vcmp.ge.f32.partialorder %v494_v37, 0.0  ;;  %v500_v46 = vadd.f32 %v2201_v34, %v2577_v39  ;;  %v1152_v51 = vmax.f32 %v2712_v44, %v2706_v26  ;;  %vm994_vm2 = vcmp.eq.s32.totalorder %v3605_v15, %v2292_v4 }
 0x1b8   :  { %v2758_v18 = vadd.s32 192, %v2196_v27  ;;  %v687_v47 = vsel %vm559_vm0, %v495_v40, %v623_v30  ;;  %v629_v10 = vmul.f32 0.01, %v501_v35  ;;  %v1161_v61 = vmax.f32 %v2735_v50, %v2730_v25 }
 0x1b9   :  { %v1155_v29 = vmax.f32 %v2740_v5, %v2717_v59  ;;  %vm929_vm15 = vcmp.eq.s32.totalorder %v3604_v9, %v2222_v54  ;;  %v2769_v39 = vadd.f32 %v2201_v34, %v2427_v42  ;;  %vm565_vm13 = vcmp.ge.f32.partialorder %v501_v35, 0.0  ;;  %v2788_v59 = vpop.permute.xlu0 %835 }
 0x1ba   :  { %v503_v58 = vadd.f32 %v2203_v36, %v2650_v41  ;;  %v2774_v40 = vadd.s32 176, %v2196_v27  ;;  %v686_v23 = vsel %vm558_vm6, %v494_v37, %v622_v55  ;;  %v497_v7 = vadd.f32 %v2203_v36, %v2427_v42  ;;  %1162 = vmax.xlane.f32.xlu1 %v1161_v61  ;;  %1153 = vmax.xlane.f32.xlu0 %v1152_v51  ;;  %v2792_v42 = vpop.permute.xlu1 %850 }
 0x1bb   :  { %v499_v33 = vadd.f32 %v2203_v36, %v2506_v13  ;;  %v2781_v30 = vadd.s32 168, %v2196_v27  ;;  %vm932_vm11 = vcmp.eq.s32.totalorder %v3606_v53, %v2224_v57  ;;  %v1052_v6 = vsel %vm924_vm12, %v687_v47, -1e+30 }
 0x1bc   :  { %v628_v37 = vmul.f32 0.01, %v500_v46  ;;  %vm992_vm5 = vcmp.eq.s32.totalorder %v2430_v17, %v2292_v4  ;;  %v2795_v55 = vadd.s32 152, %v2196_v27  ;;  %v2798_v51 = vadd.s32 160, %v2196_v27 }
 0x1bd   :  { %v498_v61 = vadd.f32 %v2201_v34, %v2506_v13  ;;  %vm564_vm4 = vcmp.ge.f32.partialorder %v500_v46, 0.0  ;;  %v693_v47 = vsel %vm565_vm13, %v501_v35, %v629_v10  ;;  %v502_v5 = vadd.f32 %v2201_v34, %v2650_v41 }
 0x1be   :  { %vm996_vm3 = vcmp.eq.s32.totalorder %v2464_v38, %v2292_v4  ;;  %v1149_v26 = vmax.f32 %v2669_v48, %v2541_v8  ;;  %v2812_v44 = vsel %vm923_vm9, %v686_v23, -1e+30  ;;  %v624_v25 = vmul.f32 0.01, %v2769_v39  ;;  %1156 = vmax.xlane.f32.xlu1 %v1155_v29  ;;  %v400_v23 = vpop.permute.xlu1 %399  ;;  %v2834_v29 = vpop.permute.xlu0 %832 }
 0x1bf   :  { %v631_v13 = vmul.f32 0.01, %v503_v58  ;;  %vm931_vm10 = vcmp.eq.s32.totalorder %v3606_v53, %v2222_v54  ;;  %v2820_v41 = vsel %vm988_vm8, 0.0, %v1052_v6  ;;  %v625_v35 = vmul.f32 0.01, %v497_v7 }
 0x1c0   :  { %v627_v10 = vmul.f32 0.01, %v499_v33  ;;  %vm567_vm0 = vcmp.ge.f32.partialorder %v503_v58, 0.0  ;;  %v3607_v20 = vmax.f32 %v2491_v28, %v2486_v11  ;;  %vm563_vm14 = vcmp.ge.f32.partialorder %v499_v33, 0.0 }
 0x1c1   :  { %vm561_vm7 = vcmp.ge.f32.partialorder %v497_v7, 0.0  ;;  %v692_v8 = vsel %vm564_vm4, %v500_v46, %v628_v37  ;;  %v1058_v48 = vsel %vm930_vm1, %v693_v47, -1e+30  ;;  %v626_v52 = vmul.f32 0.01, %v498_v61 }
 0x1c2   :  { %1147 = vmax.xlane.f32.xlu0 %v3607_v20  ;;  %v630_v6 = vmul.f32 0.01, %v502_v5  ;;  %vm928_vm8 = vcmp.eq.s32.totalorder %v2695_v24, %v2224_v57  ;;  %vm560_vm9 = vcmp.ge.f32.partialorder %v2769_v39, 0.0  ;;  %vm922_vm12 = vcmp.eq.s32.totalorder %v2596_v12, %v2224_v57  ;;  %1150 = vmax.xlane.f32.xlu1 %v1149_v26  ;;  %v395_v26 = vpop.permute.xlu1 %394 }
 0x1c3   :  { %vm566_vm6 = vcmp.ge.f32.partialorder %v502_v5, 0.0  ;;  %v695_v20 = vsel %vm567_vm0, %v503_v58, %v631_v13  ;;  %vm562_vm13 = vcmp.ge.f32.partialorder %v498_v61, 0.0  ;;  %v493_v46 = vadd.f32 %v2203_v36, %v405_v21 }
 0x1c4   :  { %vm921_vm1 = vcmp.eq.s32.totalorder %v2596_v12, %v2222_v54  ;;  %v691_v37 = vsel %vm563_vm14, %v499_v33, %v627_v10  ;;  %v492_v47 = vadd.f32 %v2201_v34, %v405_v21  ;;  %v3608_v11 = vmax.f32 %v2479_v43, %v2474_v56  ;;  %v3619_v33 = vld [vmem:[#allocation11_spill] sm:$0xff] }
 0x1c5   :  { %v2847_v28 = vsel %vm929_vm15, %v692_v8, -1e+30  ;;  %v2852_v58 = vsel %vm994_vm2, 0.0, %v1058_v48  ;;  %vm927_vm4 = vcmp.eq.s32.totalorder %v2695_v24, %v2222_v54  ;;  %vm990_vm0 = vcmp.eq.s32.totalorder %v2469_v62, %v2292_v4  ;;  %v2900_v24 = vpop.permute.xlu0 %829 }
 0x1c6   :  { %1141 = vmax.xlane.f32.xlu0 %v3608_v11  ;;  %v1056_v11 = vsel %vm928_vm8, %v691_v37, -1e+30  ;;  %v491_v8 = vadd.f32 %v2203_v36, %v400_v23  ;;  %v689_v9 = vsel %vm561_vm7, %v497_v7, %v625_v35  ;;  %v490_v48 = vadd.f32 %v2201_v34, %v400_v23  ;;  %v390_v17 = vpop.permute.xlu1 %389 }
 0x1c7   :  { %v694_v21 = vsel %vm566_vm6, %v502_v5, %v630_v6  ;;  %v1060_v15 = vsel %vm932_vm11, %v695_v20, -1e+30  ;;  %vm986_vm2 = vcmp.eq.s32.totalorder %v2519_v32, %v2292_v4  ;;  %vm920_vm15 = vcmp.eq.s32.totalorder %v2648_v31, %v2224_v57 }
 0x1c8   :  { %v690_v13 = vsel %vm562_vm13, %v498_v61, %v626_v52  ;;  %v621_v10 = vmul.f32 0.01, %v493_v46  ;;  %v688_v7 = vsel %vm560_vm9, %v2769_v39, %v624_v25  ;;  %vm919_vm14 = vcmp.eq.s32.totalorder %v2648_v31, %v2222_v54  ;;  %v3613_v52 = vld [vmem:[#allocation21_spill] sm:$0xff] }
 0x1c9   :  { %v2885_v35 = vsel %vm927_vm4, %v690_v13, -1e+30  ;;  %v2890_v61 = vsel %vm992_vm5, 0.0, %v1056_v11  ;;  %vm557_vm11 = vcmp.ge.f32.partialorder %v493_v46, 0.0  ;;  %v620_v23 = vmul.f32 0.01, %v492_v47 }
 0x1ca   :  { %3609 = vst [vmem:[#allocation6_spill] sm:$0xff] %v2885_v35  ;;  %3610 = vst [vmem:[#allocation12_spill] sm:$0xff] %v2890_v61  ;;  %v3611_v25 = vmax.f32 %v2501_v14, %v2496_v60  ;;  %v3612_v39 = vmax.f32 %v2411_v22, %v2397_v3  ;;  %vm984_vm7 = vcmp.eq.s32.totalorder %v3613_v52, %v2292_v4  ;;  %vm556_vm8 = vcmp.ge.f32.partialorder %v492_v47, 0.0 }
 0x1cb   :  { %v619_v6 = vmul.f32 0.01, %v491_v8  ;;  %v2905_v20 = vsel %vm931_vm10, %v694_v21, -1e+30  ;;  %v2910_v37 = vsel %vm996_vm3, 0.0, %v1060_v15  ;;  %vm926_vm5 = vcmp.eq.s32.totalorder %v2792_v42, %v2224_v57  ;;  %v3616_v15 = vld [vmem:[#allocation18_spill] sm:$0xff] }
 0x1cc   :  { %1144 = vmax.xlane.f32.xlu1 %v3611_v25  ;;  %1135 = vmax.xlane.f32.xlu0 %v3612_v39  ;;  %3614 = vst [vmem:[#allocation5_spill] sm:$0xff] %v2905_v20  ;;  %3615 = vst [vmem:[#allocation21_spill] sm:$0xff] %v2910_v37  ;;  %vm555_vm9 = vcmp.ge.f32.partialorder %v491_v8, 0.0  ;;  %v618_v11 = vmul.f32 0.01, %v490_v48  ;;  %v487_v13 = vadd.f32 %v2203_v36, %v390_v17  ;;  %vm554_vm13 = vcmp.ge.f32.partialorder %v490_v48, 0.0 }
 0x1cd   :  { %v685_v25 = vsel %vm557_vm11, %v493_v46, %v621_v10  ;;  %vm925_vm6 = vcmp.eq.s32.totalorder %v2792_v42, %v2222_v54  ;;  %v489_v53 = vadd.f32 %v2203_v36, %v395_v26  ;;  %vm916_vm10 = vcmp.eq.s32.totalorder %v2788_v59, %v2224_v57  ;;  %v3617_v39 = vld [vmem:[#allocation17_spill] sm:$0xff]  ;;  %v3620_v46 = vld [vmem:[#allocation10_spill] sm:$0xff] }
 0x1ce   :  { %v1212_v38 = vmax.f32 %v2885_v35, %v2890_v61  ;;  %v486_v21 = vadd.f32 %v2201_v34, %v390_v17  ;;  %v3618_v5 = vmax.f32 %v3616_v15, %v3617_v39  ;;  %v3621_v10 = vmax.f32 %v3619_v33, %v3620_v46  ;;  %v385_v35 = vpop.permute.xlu1 %384  ;;  %v3628_v46 = vld [vmem:[#allocation8_spill] sm:$0xff] }
 0x1cf   :  { %v684_v3 = vsel %vm556_vm8, %v492_v47, %v620_v23  ;;  %v2931_v22 = vadd.s32 144, %v2196_v27  ;;  %vm918_vm3 = vcmp.eq.s32.totalorder %v2725_v19, %v2224_v57  ;;  %v1054_v17 = vsel %vm926_vm5, %v689_v9, -1e+30  ;;  %v2957_v23 = vpop.permute.xlu0 %826 }
 0x1d0   :  { %1138 = vmax.xlane.f32.xlu1 %v3618_v5  ;;  %1129 = vmax.xlane.f32.xlu0 %v3621_v10  ;;  %v683_v61 = vsel %vm555_vm9, %v491_v8, %v619_v6  ;;  %v488_v5 = vadd.f32 %v2201_v34, %v395_v26  ;;  %v1218_v10 = vmax.f32 %v2905_v20, %v2910_v37  ;;  %v2949_v47 = vsel %vm925_vm6, %v688_v7, -1e+30 }
 0x1d1   :  { %vm980_vm4 = vcmp.eq.s32.totalorder %v2749_v45, %v2292_v4  ;;  %vm915_vm11 = vcmp.eq.s32.totalorder %v2788_v59, %v2222_v54  ;;  %v615_v9 = vmul.f32 0.01, %v487_v13  ;;  %v682_v8 = vsel %vm554_vm13, %v490_v48, %v618_v11  ;;  %v3623_v11 = vld [vmem:[#allocation15_spill] sm:$0xff] }
 0x1d2   :  { %v1050_v26 = vsel %vm922_vm12, %v685_v25, -1e+30  ;;  %vm982_vm8 = vcmp.eq.s32.totalorder %v2758_v18, %v2292_v4  ;;  %v617_v6 = vmul.f32 0.01, %v489_v53  ;;  %vm551_vm5 = vcmp.ge.f32.partialorder %v487_v13, 0.0  ;;  %v3624_v25 = vld [vmem:[#allocation13_spill] sm:$0xff]  ;;  %v380_v12 = vpop.permute.xlu1 %379 }
 0x1d3   :  { %v485_v37 = vadd.f32 %v2203_v36, %v385_v35  ;;  %v2963_v42 = vsel %vm921_vm1, %v684_v3, -1e+30  ;;  %vm917_vm9 = vcmp.eq.s32.totalorder %v2725_v19, %v2222_v54  ;;  %v2970_v48 = vsel %vm990_vm0, 0.0, %v1054_v17  ;;  %v3010_v39 = vpop.permute.xlu0 %823 }
 0x1d4   :  { %3622 = vst [vmem:[#allocation18_spill] sm:$0xff] %v2970_v48  ;;  %vm553_vm12 = vcmp.ge.f32.partialorder %v489_v53, 0.0  ;;  %v614_v7 = vmul.f32 0.01, %v486_v21  ;;  %v3625_v20 = vmax.f32 %v3623_v11, %v3624_v25  ;;  %1219 = vmax.xlane.f32.xlu0 %v1218_v10  ;;  %v1048_v3 = vsel %vm920_vm15, %v683_v61, -1e+30 }
 0x1d5   :  { %vm912_vm1 = vcmp.eq.s32.totalorder %v2900_v24, %v2224_v57  ;;  %vm552_vm6 = vcmp.ge.f32.partialorder %v488_v5, 0.0  ;;  %vm550_vm13 = vcmp.ge.f32.partialorder %v486_v21, 0.0  ;;  %v2983_v62 = vsel %vm919_vm14, %v682_v8, -1e+30 }
 0x1d6   :  { %1132 = vmax.xlane.f32.xlu1 %v3625_v20  ;;  %v2988_v20 = vsel %vm986_vm2, 0.0, %v1050_v26  ;;  %vm914_vm0 = vcmp.eq.s32.totalorder %v2834_v29, %v2224_v57  ;;  %vm911_vm15 = vcmp.eq.s32.totalorder %v2900_v24, %v2222_v54  ;;  %v616_v61 = vmul.f32 0.01, %v488_v5  ;;  %v375_v52 = vpop.permute.xlu1 %374 }
 0x1d7   :  { %3626 = vst [vmem:[#allocation30_spill] sm:$0xff] %v2988_v20  ;;  %v679_v17 = vsel %vm551_vm5, %v487_v13, %v615_v9  ;;  %v482_v10 = vadd.f32 %v2201_v34, %v380_v12  ;;  %v483_v31 = vadd.f32 %v2203_v36, %v380_v12  ;;  %v681_v32 = vsel %vm553_vm12, %v489_v53, %v617_v6  ;;  %v3627_v9 = vld [vmem:[#allocation9_spill] sm:$0xff] }
 0x1d8   :  { %v484_v8 = vadd.f32 %v2201_v34, %v385_v35  ;;  %v613_v26 = vmul.f32 0.01, %v485_v37  ;;  %v3004_v25 = vsel %vm984_vm7, 0.0, %v1048_v3  ;;  %1213 = vmax.xlane.f32.xlu0 %v1212_v38  ;;  %v3629_v12 = vmax.f32 %v3627_v9, %v3628_v46 }
 0x1d9   :  { %vm547_vm2 = vcmp.ge.f32.partialorder %v483_v31, 0.0  ;;  %v610_v11 = vmul.f32 0.01, %v482_v10  ;;  %v611_v13 = vmul.f32 0.01, %v483_v31  ;;  %v678_v33 = vsel %vm550_vm13, %v486_v21, %v614_v7 }
 0x1da   :  { %1126 = vmax.xlane.f32.xlu1 %v3629_v12  ;;  %v1209_v35 = vmax.f32 %v2949_v47, %v2970_v48  ;;  %vm549_vm5 = vcmp.ge.f32.partialorder %v485_v37, 0.0  ;;  %vm546_vm12 = vcmp.ge.f32.partialorder %v482_v10, 0.0  ;;  %v1044_v53 = vsel %vm916_vm10, %v679_v17, -1e+30 }
 0x1db   :  { %vm913_vm14 = vcmp.eq.s32.totalorder %v2834_v29, %v2222_v54  ;;  %vm908_vm13 = vcmp.eq.s32.totalorder %v3010_v39, %v2224_v57  ;;  %v481_v38 = vadd.f32 %v2203_v36, %v375_v52  ;;  %v1203_v21 = vmax.f32 %v2963_v42, %v2988_v20  ;;  %v370_v20 = vpop.permute.xlu1 %369 }
 0x1dc   :  { %v680_v6 = vsel %vm552_vm6, %v488_v5, %v616_v61  ;;  %v1046_v7 = vsel %vm918_vm3, %v681_v32, -1e+30  ;;  %vm910_vm10 = vcmp.eq.s32.totalorder %v2957_v23, %v2224_v57  ;;  %v612_v3 = vmul.f32 0.01, %v484_v8 }
 0x1dd   :  { %v675_v17 = vsel %vm547_vm2, %v483_v31, %v611_v13  ;;  %v1200_v12 = vmax.f32 %v2983_v62, %v3004_v25  ;;  %v3038_v48 = vsel %vm915_vm11, %v678_v33, -1e+30  ;;  %vm972_vm6 = vcmp.eq.s32.totalorder %v2795_v55, %v2292_v4 }
 0x1de   :  { %vm548_vm7 = vcmp.ge.f32.partialorder %v484_v8, 0.0  ;;  %v677_v5 = vsel %vm549_vm5, %v485_v37, %v613_v26  ;;  %v3630_v61 = vmax.f32 %v2812_v44, %v2820_v41  ;;  %v3631_v31 = vmax.f32 %v2847_v28, %v2852_v58 }
 0x1df   :  { %v3052_v59 = vsel %vm980_vm4, 0.0, %v1044_v53  ;;  %v674_v33 = vsel %vm546_vm12, %v482_v10, %v610_v11  ;;  %v480_v32 = vadd.f32 %v2201_v34, %v375_v52  ;;  %v609_v13 = vmul.f32 0.01, %v481_v38 }
 0x1e0   :  { %1207 = vmax.xlane.f32.xlu0 %v3630_v61  ;;  %1216 = vmax.xlane.f32.xlu1 %v3631_v31  ;;  %v3059_v37 = vsel %vm917_vm9, %v680_v6, -1e+30  ;;  %v3064_v26 = vsel %vm982_vm8, 0.0, %v1046_v7  ;;  %vm545_vm3 = vcmp.ge.f32.partialorder %v481_v38, 0.0  ;;  %v478_v45 = vadd.f32 %v2201_v34, %v370_v20  ;;  %v365_v61 = vpop.permute.xlu1 %364 }
 0x1e1   :  { %v479_v53 = vadd.f32 %v2203_v36, %v370_v20  ;;  %v1040_v11 = vsel %vm912_vm1, %v675_v17, -1e+30  ;;  %vm974_vm4 = vcmp.eq.s32.totalorder %v2798_v51, %v2292_v4  ;;  %v1194_v19 = vmax.f32 %v3038_v48, %v3052_v59 }
 0x1e2   :  { %v3078_v18 = vsel %vm911_vm15, %v674_v33, -1e+30  ;;  %v676_v10 = vsel %vm548_vm7, %v484_v8, %v612_v3  ;;  %v1042_v20 = vsel %vm914_vm0, %v677_v5, -1e+30  ;;  %vm542_vm11 = vcmp.ge.f32.partialorder %v478_v45, 0.0 }
 0x1e3   :  { %vm543_vm8 = vcmp.ge.f32.partialorder %v479_v53, 0.0  ;;  %v606_v52 = vmul.f32 0.01, %v478_v45  ;;  %v607_v6 = vmul.f32 0.01, %v479_v53  ;;  %vm544_vm9 = vcmp.ge.f32.partialorder %v480_v32, 0.0 }
 0x1e4   :  { %1201 = vmax.xlane.f32.xlu0 %v1200_v12  ;;  %1210 = vmax.xlane.f32.xlu1 %v1209_v35  ;;  %v608_v7 = vmul.f32 0.01, %v480_v32  ;;  %v673_v17 = vsel %vm545_vm3, %v481_v38, %v609_v13  ;;  %vm3632_vm1 = vcmp.eq.s32.totalorder %v2781_v30, %v2292_v4  ;;  %v476_v3 = vadd.f32 %v2201_v34, %v365_v61  ;;  %v360_v29 = vpop.permute.xlu1 %359 }
 0x1e5   :  { %v3088_v24 = vsel %vm3632_vm1, 0.0, %v1040_v11  ;;  %v671_v8 = vsel %vm543_vm8, %v479_v53, %v607_v6  ;;  %v477_v5 = vadd.f32 %v2203_v36, %v365_v61  ;;  %v670_v31 = vsel %vm542_vm11, %v478_v45, %v606_v52 }
 0x1e6   :  { %vm907_vm0 = vcmp.eq.s32.totalorder %v3010_v39, %v2222_v54  ;;  %v1197_v35 = vmax.f32 %v3059_v37, %v3064_v26  ;;  %v1036_v38 = vsel %vm908_vm13, %v671_v8, -1e+30  ;;  %v3102_v30 = vsel %vm913_vm14, %v676_v10, -1e+30 }
 0x1e7   :  { %v605_v12 = vmul.f32 0.01, %v477_v5  ;;  %v1188_v33 = vmax.f32 %v3078_v18, %v3088_v24  ;;  %vm3633_vm15 = vcmp.eq.s32.totalorder %v2774_v40, %v2292_v4  ;;  %v1038_v39 = vsel %vm910_vm10, %v673_v17, -1e+30 }
 0x1e8   :  { %1195 = vmax.xlane.f32.xlu0 %v1194_v19  ;;  %1204 = vmax.xlane.f32.xlu1 %v1203_v21  ;;  %v3109_v13 = vsel %vm3633_vm15, 0.0, %v1042_v20  ;;  %vm541_vm2 = vcmp.ge.f32.partialorder %v477_v5, 0.0  ;;  %v604_v45 = vmul.f32 0.01, %v476_v3  ;;  %v3114_v53 = vsel %vm907_vm0, %v670_v31, -1e+30  ;;  %v821_v21 = vpop.permute.xlu0 %820 }
 0x1e9   :  { %v672_v11 = vsel %vm544_vm9, %v480_v32, %v608_v7  ;;  %vm540_vm14 = vcmp.ge.f32.partialorder %v476_v3, 0.0  ;;  %v474_v19 = vadd.f32 %v2201_v34, %v360_v29  ;;  %v475_v10 = vadd.f32 %v2203_v36, %v360_v29  ;;  %v355_v7 = vpop.permute.xlu1 %354 }
 0x1ea   :  { %v3122_v40 = vsel %vm972_vm6, 0.0, %v1036_v38  ;;  %vm909_vm5 = vcmp.eq.s32.totalorder %v2957_v23, %v2222_v54  ;;  %v714_v20 = vadd.s32 136, %v2196_v27  ;;  %vm970_vm12 = vcmp.eq.s32.totalorder %v2931_v22, %v2292_v4 }
 0x1eb   :  { %vm906_vm7 = vcmp.eq.s32.totalorder %v821_v21, %v2224_v57  ;;  %v669_v32 = vsel %vm541_vm2, %v477_v5, %v605_v12  ;;  %v1191_v52 = vmax.f32 %v3102_v30, %v3109_v13  ;;  %v3132_v6 = vsel %vm909_vm5, %v672_v11, -1e+30 }
 0x1ec   :  { %1189 = vmax.xlane.f32.xlu0 %v1188_v33  ;;  %1198 = vmax.xlane.f32.xlu1 %v1197_v35  ;;  %v603_v55 = vmul.f32 0.01, %v475_v10  ;;  %v1182_v23 = vmax.f32 %v3114_v53, %v3122_v40  ;;  %v3139_v17 = vsel %vm974_vm4, 0.0, %v1038_v39  ;;  %v668_v61 = vsel %vm540_vm14, %v476_v3, %v604_v45  ;;  %v815_v51 = vpop.permute.xlu0 %814 }
 0x1ed   :  { %v602_v8 = vmul.f32 0.01, %v474_v19  ;;  %v472_v5 = vadd.f32 %v2201_v34, %v355_v7  ;;  %v473_v31 = vadd.f32 %v2203_v36, %v355_v7  ;;  %vm539_vm13 = vcmp.ge.f32.partialorder %v475_v10, 0.0  ;;  %v818_v36 = vpop.permute.xlu1 %817  ;;  %v3634_v7 = vld [vmem:[#allocation24_spill] sm:$0xff] }
 0x1ee   :  { %vm968_vm10 = vcmp.eq.s32.totalorder %v714_v20, %v2292_v4  ;;  %vm538_vm6 = vcmp.ge.f32.partialorder %v474_v19, 0.0  ;;  %v1034_v35 = vsel %vm906_vm7, %v669_v32, -1e+30  ;;  %v713_v38 = vadd.s32 128, %v2196_v27 }
 0x1ef   :  { %vm905_vm3 = vcmp.eq.s32.totalorder %v821_v21, %v2222_v54  ;;  %vm537_vm4 = vcmp.ge.f32.partialorder %v473_v31, 0.0  ;;  %v600_v12 = vmul.f32 0.01, %v472_v5  ;;  %v601_v3 = vmul.f32 0.01, %v473_v31 }
 0x1f0   :  { %1183 = vmax.xlane.f32.xlu0 %v1182_v23  ;;  %1192 = vmax.xlane.f32.xlu1 %v1191_v52  ;;  %vm536_vm11 = vcmp.ge.f32.partialorder %v472_v5, 0.0  ;;  %v667_v34 = vsel %vm539_vm13, %v475_v10, %v603_v55  ;;  %v1185_v33 = vmax.f32 %v3132_v6, %v3139_v17  ;;  %v3151_v39 = vsel %vm905_vm3, %v668_v61, -1e+30  ;;  %v3635_v61 = vld [vmem:[#allocation23_spill] sm:$0xff] }
 0x1f1   :  { %v665_v45 = vsel %vm537_vm4, %v473_v31, %v601_v3  ;;  %v666_v29 = vsel %vm538_vm6, %v474_v19, %v602_v8  ;;  %vm903_vm8 = vcmp.eq.s32.totalorder %v818_v36, %v2222_v54  ;;  %vm904_vm9 = vcmp.eq.s32.totalorder %v818_v36, %v2224_v57 }
 0x1f2   :  { %vm902_vm1 = vcmp.eq.s32.totalorder %v815_v51, %v2224_v57  ;;  %v3157_v27 = vsel %vm903_vm8, %v666_v29, -1e+30  ;;  %v1032_v11 = vsel %vm904_vm9, %v667_v34, -1e+30  ;;  %v3162_v21 = vsel %vm970_vm12, 0.0, %v1034_v35 }
 0x1f3   :  { %v3166_v10 = vsel %vm968_vm10, 0.0, %v1032_v11  ;;  %v664_v19 = vsel %vm536_vm11, %v472_v5, %v600_v12  ;;  %vm966_vm0 = vcmp.eq.s32.totalorder %v713_v38, %v2292_v4  ;;  %v1030_v32 = vsel %vm902_vm1, %v665_v45, -1e+30 }
 0x1f4   :  { %1186 = vmax.xlane.f32.xlu1 %v1185_v33  ;;  %v1176_v57 = vmax.f32 %v3157_v27, %v3166_v10  ;;  %vm901_vm15 = vcmp.eq.s32.totalorder %v815_v51, %v2222_v54  ;;  %v1179_v52 = vmax.f32 %v3151_v39, %v3162_v21  ;;  %v3176_v55 = vsel %vm966_vm0, 0.0, %v1030_v32 }
 0x1f5   :  { %v3174_v22 = vsel %vm901_vm15, %v664_v19, -1e+30 }
 0x1f6   :  { %1177 = vmax.xlane.f32.xlu0 %v1176_v57  ;;  %v1173_v20 = vmax.f32 %v3174_v22, %v3176_v55 }
 0x1f8   :  { %1180 = vmax.xlane.f32.xlu1 %v1179_v52 }
 0x1fc   :  { %1174 = vmax.xlane.f32.xlu1 %v1173_v20  ;;  %v3636_v20 = vld [vmem:[#allocation28_spill] sm:$0xff] }
 0x234   :  { %v1169_v4 = vpop.xlane.xlu0 %1168 }
 0x235   :  { %v1249_v23 = vsub.f32 %v3634_v7, %v1169_v4  ;;  %v1250_v8 = vsub.f32 %v3635_v61, %v1169_v4 }
 0x237   :  { %v1341_v5 = vmul.f32 1.442695, %v1249_v23  ;;  %v1343_v54 = vmul.f32 1.442695, %v1250_v8 }
 0x239   :  { %v1166_v31 = vpop.xlane.xlu0 %1165  ;;  %1717 = vpow2.f32 %v1341_v5 }
 0x23a   :  { %v1247_v35 = vsub.f32 %v2643_v1, %v1166_v31  ;;  %v1248_v38 = vsub.f32 %v2638_v16, %v1166_v31  ;;  %1719 = vpow2.f32 %v1343_v54  ;;  %v3639_v54 = vld [vmem:[#allocation29_spill] sm:$0xff] }
 0x23c   :  { %v1337_v51 = vmul.f32 1.442695, %v1247_v35  ;;  %v1339_v12 = vmul.f32 1.442695, %v1248_v38  ;;  %v3640_v35 = vld [vmem:[#allocation27_spill] sm:$0xff] }
 0x23e   :  { %v1172_v3 = vpop.xlane.xlu1 %1171  ;;  %1721 = vpow2.f32 %v1337_v51 }
 0x23f   :  { %v1160_v34 = vpop.xlane.xlu0 %1159  ;;  %v1251_v36 = vsub.f32 %v2700_v2, %v1172_v3  ;;  %v1252_v33 = vsub.f32 %v2677_v0, %v1172_v3  ;;  %1723 = vpow2.f32 %v1339_v12  ;;  %v3637_v2 = vld [vmem:[#allocation26_spill] sm:$0xff] }
 0x240   :  { %v1243_v45 = vsub.f32 %v2682_v63, %v1160_v34  ;;  %v1244_v29 = vsub.f32 %v2655_v49, %v1160_v34  ;;  %v3638_v49 = vld [vmem:[#allocation7_spill] sm:$0xff] }
 0x241   :  { %v1345_v11 = vmul.f32 1.442695, %v1251_v36  ;;  %v1347_v19 = vmul.f32 1.442695, %v1252_v33 }
 0x242   :  { %v1329_v32 = vmul.f32 1.442695, %v1243_v45  ;;  %v1331_v1 = vmul.f32 1.442695, %v1244_v29  ;;  %v3642_v45 = vld [vmem:[#allocation19_spill] sm:$0xff] }
 0x243   :  { %v1163_v16 = vpop.xlane.xlu1 %1162  ;;  %v1154_v57 = vpop.xlane.xlu0 %1153  ;;  %1725 = vpow2.f32 %v1345_v11 }
 0x244   :  { %v1245_v52 = vsub.f32 %v2735_v50, %v1163_v16  ;;  %v1246_v4 = vsub.f32 %v3636_v20, %v1163_v16  ;;  %v1239_v7 = vsub.f32 %v3637_v2, %v1154_v57  ;;  %1727 = vpow2.f32 %v1347_v19  ;;  %v3641_v50 = vld [vmem:[#allocation20_spill] sm:$0xff]  ;;  %v3643_v16 = vld [vmem:[#allocation25_spill] sm:$0xff] }
 0x245   :  { %1729 = vpow2.f32 %v1329_v32  ;;  %v1240_v23 = vsub.f32 %v3638_v49, %v1154_v57 }
 0x246   :  { %v1333_v0 = vmul.f32 1.442695, %v1245_v52  ;;  %v1335_v63 = vmul.f32 1.442695, %v1246_v4  ;;  %1731 = vpow2.f32 %v1331_v1  ;;  %v1321_v61 = vmul.f32 1.442695, %v1239_v7  ;;  %v3195_v12 = vpop.eup %1717 }
 0x247   :  { %v1157_v8 = vpop.xlane.xlu1 %1156  ;;  %v3197_v3 = vpop.eup %1719  ;;  %v1323_v34 = vmul.f32 1.442695, %v1240_v23  ;;  %v3644_v52 = vld [vmem:[#allocation22_spill] sm:$0xff] }
 0x248   :  { %1733 = vpow2.f32 %v1333_v0  ;;  %v1241_v31 = vsub.f32 %v3639_v54, %v1157_v8  ;;  %v1242_v38 = vsub.f32 %v3640_v35, %v1157_v8  ;;  %v1455_v1 = vadd.f32 %v3197_v3, %v3195_v12 }
 0x249   :  { %1735 = vpow2.f32 %v1335_v63 }
 0x24a   :  { %v1325_v36 = vmul.f32 1.442695, %v1241_v31  ;;  %v1327_v33 = vmul.f32 1.442695, %v1242_v38  ;;  %1737 = vpow2.f32 %v1321_v61  ;;  %1456 = vadd.xlane.f32.xlu1 %v1455_v1 }
 0x24b   :  { %v1148_v5 = vpop.xlane.xlu0 %1147  ;;  %v1151_v19 = vpop.xlane.xlu1 %1150 }
 0x24c   :  { %v1235_v51 = vsub.f32 %v3641_v50, %v1148_v5  ;;  %v1236_v29 = vsub.f32 %v3642_v45, %v1148_v5  ;;  %1739 = vpow2.f32 %v1325_v36  ;;  %v1237_v57 = vsub.f32 %v3643_v16, %v1151_v19  ;;  %v3205_v63 = vpop.eup %1721 }
 0x24d   :  { %v1238_v20 = vsub.f32 %v3644_v52, %v1151_v19  ;;  %1741 = vpow2.f32 %v1327_v33  ;;  %v3208_v5 = vpop.eup %1723  ;;  %v3646_v33 = vld [vmem:[#allocation14_spill] sm:$0xff] }
 0x24e   :  { %v1313_v11 = vmul.f32 1.442695, %v1235_v51  ;;  %1743 = vpow2.f32 %v1323_v34  ;;  %v1315_v2 = vmul.f32 1.442695, %v1236_v29  ;;  %v1317_v7 = vmul.f32 1.442695, %v1237_v57 }
 0x24f   :  { %v1142_v32 = vpop.xlane.xlu0 %1141  ;;  %v1319_v0 = vmul.f32 1.442695, %v1238_v20  ;;  %v3645_v51 = vld [vmem:[#allocation16_spill] sm:$0xff]  ;;  %v1452_v57 = vadd.f32 %v3208_v5, %v3205_v63 }
 0x250   :  { %v1231_v4 = vsub.f32 %v2479_v43, %v1142_v32  ;;  %1745 = vpow2.f32 %v1313_v11  ;;  %v1232_v49 = vsub.f32 %v2474_v56, %v1142_v32  ;;  %v3212_v31 = vpop.eup %1725  ;;  %v3647_v32 = vld [vmem:[#allocation17_spill] sm:$0xff] }
 0x251   :  { %1747 = vpow2.f32 %v1317_v7  ;;  %v3214_v35 = vpop.eup %1727  ;;  %v3648_v7 = vld [vmem:[#allocation11_spill] sm:$0xff] }
 0x252   :  { %v1305_v23 = vmul.f32 1.442695, %v1231_v4  ;;  %1749 = vpow2.f32 %v1319_v0  ;;  %v3217_v34 = vpop.eup %1729  ;;  %v1307_v36 = vmul.f32 1.442695, %v1232_v49 }
 0x253   :  { %1751 = vpow2.f32 %v1315_v2  ;;  %v3222_v11 = vpop.eup %1731 }
 0x254   :  { %1753 = vpow2.f32 %v1305_v23  ;;  %v3649_v23 = vld [vmem:[#allocation10_spill] sm:$0xff] }
 0x255   :  { %v1145_v61 = vpop.xlane.xlu1 %1144  ;;  %v1136_v8 = vpop.xlane.xlu0 %1135 }
 0x256   :  { %v1233_v54 = vsub.f32 %v2501_v14, %v1145_v61  ;;  %v1234_v43 = vsub.f32 %v2496_v60, %v1145_v61  ;;  %v1227_v56 = vsub.f32 %v3645_v51, %v1136_v8  ;;  %v1228_v45 = vsub.f32 %v3646_v33, %v1136_v8  ;;  %v3226_v16 = vpop.eup %1733  ;;  %v3651_v51 = vld [vmem:[#allocation13_spill] sm:$0xff] }
 0x257   :  { %v1458_v60 = vadd.f32 %v3214_v35, %v3212_v31  ;;  %v3230_v52 = vpop.eup %1735  ;;  %v3652_v33 = vld [vmem:[#allocation5_spill] sm:$0xff] }
 0x258   :  { %v1309_v38 = vmul.f32 1.442695, %v1233_v54  ;;  %v1311_v50 = vmul.f32 1.442695, %v1234_v43  ;;  %v1297_v20 = vmul.f32 1.442695, %v1227_v56  ;;  %v1449_v54 = vadd.f32 %v3230_v52, %v3226_v16  ;;  %v3236_v43 = vpop.eup %1737 }
 0x259   :  { %v1139_v29 = vpop.xlane.xlu1 %1138  ;;  %v1130_v14 = vpop.xlane.xlu0 %1129  ;;  %1459 = vadd.xlane.f32.xlu0 %v1458_v60  ;;  %v1299_v49 = vmul.f32 1.442695, %v1228_v45 }
 0x25a   :  { %1755 = vpow2.f32 %v1309_v38  ;;  %v1229_v19 = vsub.f32 %v3616_v15, %v1139_v29  ;;  %v1230_v1 = vsub.f32 %v3647_v32, %v1139_v29  ;;  %v1223_v0 = vsub.f32 %v3648_v7, %v1130_v14  ;;  %v3650_v38 = vld [vmem:[#allocation15_spill] sm:$0xff]  ;;  %v3241_v60 = vpop.eup %1739  ;;  %1450 = vadd.xlane.f32.xlu1 %v1449_v54 }
 0x25b   :  { %1757 = vpow2.f32 %v1311_v50  ;;  %v1224_v15 = vsub.f32 %v3649_v23, %v1130_v14  ;;  %v3244_v14 = vpop.eup %1741 }
 0x25c   :  { %v1301_v4 = vmul.f32 1.442695, %v1229_v19  ;;  %v1303_v2 = vmul.f32 1.442695, %v1230_v1  ;;  %1759 = vpow2.f32 %v1307_v36  ;;  %v3653_v36 = vld [vmem:[#allocation21_spill] sm:$0xff] }
 0x25d   :  { %v1220_v8 = vpop.xlane.xlu0 %1219  ;;  %1453 = vadd.xlane.f32.xlu0 %v1452_v57  ;;  %v1289_v19 = vmul.f32 1.442695, %v1223_v0  ;;  %v1291_v7 = vmul.f32 1.442695, %v1224_v15  ;;  %v3655_v15 = vld [vmem:[#allocation12_spill] sm:$0xff] }
 0x25e   :  { %1761 = vpow2.f32 %v1301_v4  ;;  %v1283_v29 = vsub.f32 %v3652_v33, %v1220_v8  ;;  %v1284_v45 = vsub.f32 %v3653_v36, %v1220_v8  ;;  %v3246_v4 = vpop.eup %1743 }
 0x25f   :  { %v1133_v61 = vpop.xlane.xlu1 %1132  ;;  %1763 = vpow2.f32 %v1303_v2  ;;  %v1443_v2 = vadd.f32 %v3244_v14, %v3241_v60  ;;  %v3252_v57 = vpop.eup %1745 }
 0x260   :  { %v1225_v50 = vsub.f32 %v3650_v38, %v1133_v61  ;;  %v1226_v56 = vsub.f32 %v3651_v51, %v1133_v61  ;;  %1765 = vpow2.f32 %v1297_v20  ;;  %v1446_v38 = vadd.f32 %v3222_v11, %v3217_v34  ;;  %v3654_v20 = vld [vmem:[#allocation6_spill] sm:$0xff] }
 0x261   :  { %1767 = vpow2.f32 %v1299_v49  ;;  %v1214_v23 = vpop.xlane.xlu0 %1213  ;;  %v1409_v8 = vmul.f32 1.442695, %v1283_v29  ;;  %v1411_v49 = vmul.f32 1.442695, %v1284_v45  ;;  %1444 = vadd.xlane.f32.xlu1 %v1443_v2 }
 0x262   :  { %v1293_v32 = vmul.f32 1.442695, %v1225_v50  ;;  %v1295_v1 = vmul.f32 1.442695, %v1226_v56  ;;  %v1279_v0 = vsub.f32 %v3654_v20, %v1214_v23  ;;  %v3256_v50 = vpop.eup %1747  ;;  %v1280_v51 = vsub.f32 %v3655_v15, %v1214_v23  ;;  %1447 = vadd.xlane.f32.xlu0 %v1446_v38 }
 0x263   :  { %v1127_v61 = vpop.xlane.xlu1 %1126  ;;  %v3260_v33 = vpop.eup %1749 }
 0x264   :  { %1769 = vpow2.f32 %v1293_v32  ;;  %v1221_v54 = vsub.f32 %v3627_v9, %v1127_v61  ;;  %v1222_v56 = vsub.f32 %v3628_v46, %v1127_v61  ;;  %v3262_v32 = vpop.eup %1751  ;;  %v1437_v45 = vadd.f32 %v3260_v33, %v3256_v50 }
 0x265   :  { %1771 = vpow2.f32 %v1295_v1  ;;  %v1440_v1 = vadd.f32 %v3246_v4, %v3236_v43  ;;  %v3268_v23 = vpop.eup %1753  ;;  %v1401_v46 = vmul.f32 1.442695, %v1279_v0 }
 0x266   :  { %1773 = vpow2.f32 %v1289_v19  ;;  %v1285_v36 = vmul.f32 1.442695, %v1221_v54  ;;  %v1287_v29 = vmul.f32 1.442695, %v1222_v56  ;;  %1438 = vadd.xlane.f32.xlu1 %v1437_v45 }
 0x267   :  { %1775 = vpow2.f32 %v1291_v7  ;;  %v3272_v38 = vpop.eup %1755  ;;  %v1403_v7 = vmul.f32 1.442695, %v1280_v51  ;;  %1441 = vadd.xlane.f32.xlu0 %v1440_v1  ;;  %v3657_v1 = vld [vmem:[#allocation18_spill] sm:$0xff] }
 0x268   :  { %1777 = vpow2.f32 %v1409_v8  ;;  %v3276_v15 = vpop.eup %1757 }
 0x269   :  { %v1208_v20 = vpop.xlane.xlu0 %1207  ;;  %v1217_v9 = vpop.xlane.xlu1 %1216  ;;  %1779 = vpow2.f32 %v1411_v49  ;;  %v1431_v49 = vadd.f32 %v3276_v15, %v3272_v38 }
 0x26a   :  { %v1275_v61 = vsub.f32 %v2812_v44, %v1208_v20  ;;  %v1281_v19 = vsub.f32 %v2847_v28, %v1217_v9  ;;  %v1276_v2 = vsub.f32 %v2820_v41, %v1208_v20  ;;  %v1282_v54 = vsub.f32 %v2852_v58, %v1217_v9  ;;  %v3282_v51 = vpop.eup %1759 }
 0x26b   :  { %1781 = vpow2.f32 %v1285_v36  ;;  %v1434_v28 = vadd.f32 %v3262_v32, %v3252_v57  ;;  %v3286_v36 = vpop.eup %1761  ;;  %1432 = vadd.xlane.f32.xlu1 %v1431_v49 }
 0x26c   :  { %v1405_v56 = vmul.f32 1.442695, %v1281_v19  ;;  %1783 = vpow2.f32 %v1287_v29  ;;  %v1407_v8 = vmul.f32 1.442695, %v1282_v54  ;;  %v1393_v41 = vmul.f32 1.442695, %v1275_v61  ;;  %v3290_v19 = vpop.eup %1763 }
 0x26d   :  { %v1202_v0 = vpop.xlane.xlu0 %1201  ;;  %v1211_v44 = vpop.xlane.xlu1 %1210  ;;  %1785 = vpow2.f32 %v1401_v46  ;;  %3656 = vst [vmem:[#allocation9_spill] sm:$0xff] %v3286_v36  ;;  %v1395_v29 = vmul.f32 1.442695, %v1276_v2  ;;  %1435 = vadd.xlane.f32.xlu0 %v1434_v28 }
 0x26e   :  { %v1271_v58 = vsub.f32 %v2983_v62, %v1202_v0  ;;  %v1277_v20 = vsub.f32 %v2949_v47, %v1211_v44  ;;  %1787 = vpow2.f32 %v1403_v7  ;;  %v1272_v9 = vsub.f32 %v3004_v25, %v1202_v0  ;;  %v3292_v46 = vpop.eup %1765 }
 0x26f   :  { %v1278_v45 = vsub.f32 %v3657_v1, %v1211_v44  ;;  %1789 = vpow2.f32 %v1405_v56  ;;  %v1428_v7 = vadd.f32 %v3282_v51, %v3268_v23  ;;  %v1425_v25 = vadd.f32 %v3290_v19, %v3286_v36  ;;  %v3298_v2 = vpop.eup %1767 }
 0x270   :  { %v1397_v54 = vmul.f32 1.442695, %v1277_v20  ;;  %1791 = vpow2.f32 %v1407_v8  ;;  %v1385_v0 = vmul.f32 1.442695, %v1271_v58  ;;  %v1387_v8 = vmul.f32 1.442695, %v1272_v9 }
 0x271   :  { %v1399_v62 = vmul.f32 1.442695, %v1278_v45  ;;  %v1196_v61 = vpop.xlane.xlu0 %1195  ;;  %v1205_v47 = vpop.xlane.xlu1 %1204  ;;  %1793 = vpow2.f32 %v1393_v41  ;;  %v3658_v20 = vld [vmem:[#allocation30_spill] sm:$0xff]  ;;  %1429 = vadd.xlane.f32.xlu0 %v1428_v7  ;;  %1426 = vadd.xlane.f32.xlu1 %v1425_v25 }
 0x272   :  { %v1267_v44 = vsub.f32 %v3038_v48, %v1196_v61  ;;  %v1273_v56 = vsub.f32 %v2963_v42, %v1205_v47  ;;  %v3302_v28 = vpop.eup %1769  ;;  %1795 = vpow2.f32 %v1395_v29  ;;  %v1268_v49 = vsub.f32 %v3052_v59, %v1196_v61 }
 0x273   :  { %v1274_v1 = vsub.f32 %v3658_v20, %v1205_v47  ;;  %v3306_v45 = vpop.eup %1771  ;;  %1797 = vpow2.f32 %v1397_v54  ;;  %v1422_v29 = vadd.f32 %v3298_v2, %v3292_v46 }
 0x274   :  { %v1389_v36 = vmul.f32 1.442695, %v1273_v56  ;;  %v3308_v41 = vpop.eup %1773  ;;  %1799 = vpow2.f32 %v1399_v62  ;;  %v1419_v59 = vadd.f32 %v3306_v45, %v3302_v28  ;;  %v1377_v61 = vmul.f32 1.442695, %v1267_v44 }
 0x275   :  { %v1391_v48 = vmul.f32 1.442695, %v1274_v1  ;;  %v1190_v58 = vpop.xlane.xlu0 %1189  ;;  %v1199_v42 = vpop.xlane.xlu1 %1198  ;;  %1801 = vpow2.f32 %v1385_v0  ;;  %v1379_v62 = vmul.f32 1.442695, %v1268_v49  ;;  %1423 = vadd.xlane.f32.xlu0 %v1422_v29 }
 0x276   :  { %v3314_v9 = vpop.eup %1775  ;;  %v1263_v47 = vsub.f32 %v3078_v18, %v1190_v58  ;;  %v1269_v54 = vsub.f32 %v3059_v37, %v1199_v42  ;;  %1803 = vpow2.f32 %v1387_v8  ;;  %v1264_v25 = vsub.f32 %v3088_v24, %v1190_v58  ;;  %1420 = vadd.xlane.f32.xlu1 %v1419_v59 }
 0x277   :  { %v3318_v7 = vpop.eup %1777  ;;  %v1270_v56 = vsub.f32 %v3064_v26, %v1199_v42  ;;  %1805 = vpow2.f32 %v1389_v36  ;;  %v1416_v8 = vadd.f32 %v3314_v9, %v3308_v41 }
 0x278   :  { %v3322_v20 = vpop.eup %1779  ;;  %v1381_v1 = vmul.f32 1.442695, %v1269_v54  ;;  %1807 = vpow2.f32 %v1391_v48  ;;  %v1369_v24 = vmul.f32 1.442695, %v1263_v47  ;;  %v1371_v36 = vmul.f32 1.442695, %v1264_v25 }
 0x279   :  { %v3324_v0 = vpop.eup %1781  ;;  %v1383_v18 = vmul.f32 1.442695, %v1270_v56  ;;  %v1184_v44 = vpop.xlane.xlu0 %1183  ;;  %1809 = vpow2.f32 %v1377_v61  ;;  %1417 = vadd.xlane.f32.xlu0 %v1416_v8 }
 0x27a   :  { %v1193_v37 = vpop.xlane.xlu1 %1192  ;;  %v3328_v49 = vpop.eup %1783  ;;  %1811 = vpow2.f32 %v1379_v62  ;;  %v1259_v59 = vsub.f32 %v3114_v53, %v1184_v44 }
 0x27b   :  { %v1265_v26 = vsub.f32 %v3102_v30, %v1193_v37  ;;  %v3331_v58 = vpop.eup %1785  ;;  %v1266_v42 = vsub.f32 %v3109_v13, %v1193_v37  ;;  %v1413_v48 = vadd.f32 %v3328_v49, %v3324_v0  ;;  %1813 = vpow2.f32 %v1381_v1 }
 0x27c   :  { %v3336_v29 = vpop.eup %1787  ;;  %1815 = vpow2.f32 %v1383_v18  ;;  %v1260_v30 = vsub.f32 %v3122_v40, %v1184_v44  ;;  %v1506_v13 = vadd.f32 %v3322_v20, %v3318_v7  ;;  %v1361_v37 = vmul.f32 1.442695, %v1259_v59 }
 0x27d   :  { %v1373_v54 = vmul.f32 1.442695, %v1265_v26  ;;  %v3339_v61 = vpop.eup %1789  ;;  %v1375_v47 = vmul.f32 1.442695, %v1266_v42  ;;  %1414 = vadd.xlane.f32.xlu1 %v1413_v48  ;;  %1817 = vpow2.f32 %v1369_v24  ;;  %v1500_v18 = vadd.f32 %v3336_v29, %v3331_v58 }
 0x27e   :  { %v1187_v62 = vpop.xlane.xlu1 %1186  ;;  %v3344_v25 = vpop.eup %1791  ;;  %1819 = vpow2.f32 %v1371_v36  ;;  %1507 = vadd.xlane.f32.xlu0 %v1506_v13 }
 0x27f   :  { %v1261_v56 = vsub.f32 %v3132_v6, %v1187_v62  ;;  %v1262_v1 = vsub.f32 %v3139_v17, %v1187_v62  ;;  %v3348_v53 = vpop.eup %1793  ;;  %v1503_v40 = vadd.f32 %v3344_v25, %v3339_v61  ;;  %1821 = vpow2.f32 %v1373_v54  ;;  %v1178_v26 = vpop.xlane.xlu0 %1177 }
 0x280   :  { %v3354_v44 = vpop.eup %1795  ;;  %v1363_v17 = vmul.f32 1.442695, %v1260_v30  ;;  %1823 = vpow2.f32 %v1375_v47  ;;  %v1255_v36 = vsub.f32 %v3157_v27, %v1178_v26  ;;  %v1256_v42 = vsub.f32 %v3166_v10, %v1178_v26 }
 0x281   :  { %v1365_v8 = vmul.f32 1.442695, %v1261_v56  ;;  %v1367_v24 = vmul.f32 1.442695, %v1262_v1  ;;  %v3356_v6 = vpop.eup %1797  ;;  %1504 = vadd.xlane.f32.xlu1 %v1503_v40 }
 0x282   :  { %v1181_v48 = vpop.xlane.xlu1 %1180  ;;  %v3360_v62 = vpop.eup %1799  ;;  %v1353_v56 = vmul.f32 1.442695, %v1255_v36  ;;  %1501 = vadd.xlane.f32.xlu0 %v1500_v18  ;;  %v1355_v40 = vmul.f32 1.442695, %v1256_v42 }
 0x283   :  { %1825 = vpow2.f32 %v1365_v8  ;;  %v1257_v13 = vsub.f32 %v3151_v39, %v1181_v48  ;;  %v1258_v59 = vsub.f32 %v3162_v21, %v1181_v48  ;;  %v3364_v54 = vpop.eup %1801  ;;  %v1497_v30 = vadd.f32 %v3360_v62, %v3356_v6 }
 0x284   :  { %1827 = vpow2.f32 %v1367_v24  ;;  %v3368_v47 = vpop.eup %1803  ;;  %v1494_v21 = vadd.f32 %v3354_v44, %v3348_v53 }
 0x285   :  { %1829 = vpow2.f32 %v1361_v37  ;;  %v1357_v27 = vmul.f32 1.442695, %v1257_v13  ;;  %v1359_v10 = vmul.f32 1.442695, %v1258_v59  ;;  %v3370_v1 = vpop.eup %1805  ;;  %1498 = vadd.xlane.f32.xlu1 %v1497_v30 }
 0x286   :  { %1831 = vpow2.f32 %v1363_v17  ;;  %v1175_v39 = vpop.xlane.xlu1 %1174  ;;  %v3374_v8 = vpop.eup %1807  ;;  %1495 = vadd.xlane.f32.xlu0 %v1494_v21 }
 0x287   :  { %1833 = vpow2.f32 %v1353_v56  ;;  %v1253_v18 = vsub.f32 %v3174_v22, %v1175_v39  ;;  %v1254_v24 = vsub.f32 %v3176_v55, %v1175_v39  ;;  %v3378_v26 = vpop.eup %1809  ;;  %v1491_v37 = vadd.f32 %v3374_v8, %v3370_v1 }
 0x288   :  { %1835 = vpow2.f32 %v1357_v27  ;;  %v3382_v17 = vpop.eup %1811  ;;  %v1488_v22 = vadd.f32 %v3368_v47, %v3364_v54 }
 0x289   :  { %1837 = vpow2.f32 %v1359_v10  ;;  %v1349_v36 = vmul.f32 1.442695, %v1253_v18  ;;  %v1351_v42 = vmul.f32 1.442695, %v1254_v24  ;;  %v3384_v48 = vpop.eup %1813  ;;  %1492 = vadd.xlane.f32.xlu1 %v1491_v37  ;;  %v1482_v27 = vadd.f32 %v3382_v17, %v3378_v26 }
 0x28a   :  { %1839 = vpow2.f32 %v1355_v40  ;;  %v3388_v55 = vpop.eup %1815  ;;  %1489 = vadd.xlane.f32.xlu0 %v1488_v22 }
 0x28b   :  { %1841 = vpow2.f32 %v1349_v36  ;;  %v3390_v13 = vpop.eup %1817  ;;  %v1485_v59 = vadd.f32 %v3388_v55, %v3384_v48 }
 0x28c   :  { %3659 = vst [vmem:[#allocation8_spill] sm:$0xff] %v3390_v13  ;;  %1843 = vpow2.f32 %v1351_v42  ;;  %v3394_v56 = vpop.eup %1819 }
 0x28d   :  { %3660 = vst [vmem:[#allocation24_spill] sm:$0xff] %v3394_v56  ;;  %v3396_v30 = vpop.eup %1821  ;;  %1486 = vadd.xlane.f32.xlu1 %v1485_v59  ;;  %v1476_v24 = vadd.f32 %v3394_v56, %v3390_v13 }
 0x28e   :  { %3661 = vst [vmem:[#allocation23_spill] sm:$0xff] %v3396_v30  ;;  %v3400_v10 = vpop.eup %1823  ;;  %1483 = vadd.xlane.f32.xlu0 %v1482_v27 }
 0x28f   :  { %v1479_v39 = vadd.f32 %v3400_v10, %v3396_v30 }
 0x290   :  { %v3402_v40 = vpop.eup %1825 }
 0x291   :  { %3662 = vst [vmem:[#allocation28_spill] sm:$0xff] %v3402_v40  ;;  %v3406_v21 = vpop.eup %1827  ;;  %1480 = vadd.xlane.f32.xlu1 %v1479_v39 }
 0x292   :  { %3663 = vst [vmem:[#allocation26_spill] sm:$0xff] %v3406_v21  ;;  %v3408_v18 = vpop.eup %1829  ;;  %v1473_v37 = vadd.f32 %v3406_v21, %v3402_v40  ;;  %1477 = vadd.xlane.f32.xlu0 %v1476_v24 }
 0x293   :  { %3664 = vst [vmem:[#allocation7_spill] sm:$0xff] %v3408_v18  ;;  %v3414_v36 = vpop.eup %1831 }
 0x294   :  { %3665 = vst [vmem:[#allocation29_spill] sm:$0xff] %v3414_v36  ;;  %v3416_v42 = vpop.eup %1833  ;;  %v1470_v27 = vadd.f32 %v3414_v36, %v3408_v18 }
 0x295   :  { %3666 = vst [vmem:[#allocation27_spill] sm:$0xff] %v3416_v42  ;;  %v3418_v22 = vpop.eup %1835  ;;  %1474 = vadd.xlane.f32.xlu1 %v1473_v37 }
 0x296   :  { %3667 = vst [vmem:[#allocation20_spill] sm:$0xff] %v3418_v22  ;;  %v3420_v59 = vpop.eup %1837  ;;  %1471 = vadd.xlane.f32.xlu0 %v1470_v27 }
 0x297   :  { %3668 = vst [vmem:[#allocation19_spill] sm:$0xff] %v3420_v59  ;;  %v3424_v39 = vpop.eup %1839  ;;  %v1467_v13 = vadd.f32 %v3420_v59, %v3418_v22 }
 0x298   :  { %3669 = vst [vmem:[#allocation25_spill] sm:$0xff] %v3424_v39  ;;  %v3428_v56 = vpop.eup %1841  ;;  %v1464_v24 = vadd.f32 %v3424_v39, %v3416_v42 }
 0x299   :  { %v3430_v40 = vpop.eup %1843  ;;  %1468 = vadd.xlane.f32.xlu1 %v1467_v13 }
 0x29a   :  { %v1461_v37 = vadd.f32 %v3430_v40, %v3428_v56  ;;  %1465 = vadd.xlane.f32.xlu0 %v1464_v24 }
 0x29d   :  { %1462 = vadd.xlane.f32.xlu1 %v1461_v37 }
 0x2d3   :  { %v1457_v18 = vpop.xlane.xlu1 %1456 }
 0x2d4   :  { %1845 = vrcp.f32 %v1457_v18 }
 0x2e1   :  { %v1846_v42 = vpop.eup %1845 }
 0x2e2   :  { %v1460_v36 = vpop.xlane.xlu0 %1459 }
 0x2e3   :  { %1847 = vrcp.f32 %v1460_v36  ;;  %v1451_v22 = vpop.xlane.xlu1 %1450 }
 0x2e6   :  { %v1454_v21 = vpop.xlane.xlu0 %1453 }
 0x2e7   :  { %1849 = vrcp.f32 %v1454_v21  ;;  %v1570_v21 = vmul.f32 %v1846_v42, %v3197_v3 }
 0x2e8   :  { %1851 = vrcp.f32 %v1451_v22 }
 0x2ea   :  { %v1445_v59 = vpop.xlane.xlu1 %1444 }
 0x2eb   :  { %v1448_v27 = vpop.xlane.xlu0 %1447 }
 0x2ec   :  { %1853 = vrcp.f32 %v1448_v27 }
 0x2ed   :  { %1855 = vrcp.f32 %v1445_v59  ;;  %v1569_v59 = vmul.f32 %v1846_v42, %v3195_v12 }
 0x2ef   :  { %v1439_v30 = vpop.xlane.xlu1 %1438 }
 0x2f0   :  { %v1442_v13 = vpop.xlane.xlu0 %1441  ;;  %v1848_v39 = vpop.eup %1847 }
 0x2f1   :  { %1857 = vrcp.f32 %v1442_v13  ;;  %v1572_v24 = vmul.f32 %v1848_v39, %v3214_v35  ;;  %v1571_v18 = vmul.f32 %v1848_v39, %v3212_v31 }
 0x2f2   :  { %1859 = vrcp.f32 %v1439_v30 }
 0x2f3   :  { %1605 = vmatprep.subr.mxu0 %v1572_v24 }
 0x2f4   :  { %v1433_v36 = vpop.xlane.xlu1 %1432  ;;  %v1850_v22 = vpop.eup %1849  ;;  %1606 = vmatpush1.msra.mxu0 %v1571_v18 }
 0x2f5   :  { %v1852_v27 = vpop.eup %1851  ;;  %1607 = vmatprep.subr.mxu0 %v1570_v21  ;;  %v1568_v13 = vmul.f32 %v1850_v22, %v3208_v5  ;;  %v1567_v30 = vmul.f32 %v1850_v22, %v3205_v63 }
 0x2f6   :  { %v1436_v37 = vpop.xlane.xlu0 %1435  ;;  %1608 = vmatpush1.msra.mxu0 %v1569_v59  ;;  %v1566_v39 = vmul.f32 %v1852_v27, %v3230_v52  ;;  %v1565_v3 = vmul.f32 %v1852_v27, %v3226_v16 }
 0x2f7   :  { %1861 = vrcp.f32 %v1436_v37  ;;  %1609 = vmatprep.subr.mxu0 %v1568_v13 }
 0x2f8   :  { %1863 = vrcp.f32 %v1433_v36  ;;  %1610 = vmatpush1.msra.mxu0 %v1567_v30 }
 0x2f9   :  { %v1854_v24 = vpop.eup %1853  ;;  %1611 = vmatprep.subr.mxu0 %v1566_v39 }
 0x2fa   :  { %v1430_v35 = vpop.xlane.xlu0 %1429  ;;  %v1427_v31 = vpop.xlane.xlu1 %1426  ;;  %v1564_v12 = vmul.f32 %v1854_v24, %v3222_v11  ;;  %v1563_v5 = vmul.f32 %v1854_v24, %v3217_v34  ;;  %1612 = vmatpush1.msra.mxu0 %v1565_v3 }
 0x2fb   :  { %1865 = vrcp.f32 %v1430_v35  ;;  %v1856_v18 = vpop.eup %1855 }
 0x2fc   :  { %1867 = vrcp.f32 %v1427_v31  ;;  %1613 = vmatprep.subr.mxu0 %v1564_v12  ;;  %v1562_v37 = vmul.f32 %v1856_v18, %v3244_v14  ;;  %v1561_v52 = vmul.f32 %v1856_v18, %v3241_v60  ;;  %v3670_v18 = vld [vmem:[#allocation9_spill] sm:$0xff] }
 0x2fd   :  { %1614 = vmatpush1.msra.mxu0 %v1563_v5 }
 0x2fe   :  { %v1424_v42 = vpop.xlane.xlu0 %1423  ;;  %v1858_v36 = vpop.eup %1857  ;;  %1615 = vmatprep.subr.mxu0 %v1562_v37 }
 0x2ff   :  { %v1421_v63 = vpop.xlane.xlu1 %1420  ;;  %1869 = vrcp.f32 %v1424_v42  ;;  %v1860_v21 = vpop.eup %1859  ;;  %v1560_v16 = vmul.f32 %v1858_v36, %v3246_v4  ;;  %v1559_v11 = vmul.f32 %v1858_v36, %v3236_v43  ;;  %1616 = vmatpush1.msra.mxu0 %v1561_v52 }
 0x300   :  { %1871 = vrcp.f32 %v1421_v63  ;;  %v1558_v34 = vmul.f32 %v1860_v21, %v3260_v33  ;;  %v1557_v14 = vmul.f32 %v1860_v21, %v3256_v50 }
 0x301   :  { %1617 = vmatprep.subr.mxu0 %v1560_v16 }
 0x302   :  { %v1418_v22 = vpop.xlane.xlu0 %1417  ;;  %1618 = vmatpush1.msra.mxu0 %v1559_v11 }
 0x303   :  { %1873 = vrcp.f32 %v1418_v22  ;;  %1619 = vmatprep.subr.mxu0 %v1558_v34 }
 0x304   :  { %v1862_v59 = vpop.eup %1861  ;;  %1620 = vmatpush1.msra.mxu0 %v1557_v14 }
 0x305   :  { %v1864_v13 = vpop.eup %1863  ;;  %v1556_v60 = vmul.f32 %v1862_v59, %v3262_v32  ;;  %v1555_v4 = vmul.f32 %v1862_v59, %v3252_v57 }
 0x306   :  { %v1415_v27 = vpop.xlane.xlu1 %1414  ;;  %v1554_v43 = vmul.f32 %v1864_v13, %v3276_v15  ;;  %v1553_v31 = vmul.f32 %v1864_v13, %v3272_v38 }
 0x307   :  { %1875 = vrcp.f32 %v1415_v27  ;;  %v1508_v30 = vpop.xlane.xlu0 %1507  ;;  %1621 = vmatprep.subr.mxu0 %v1556_v60 }
 0x308   :  { %1877 = vrcp.f32 %v1508_v30  ;;  %v1866_v35 = vpop.eup %1865  ;;  %1622 = vmatpush1.msra.mxu0 %v1555_v4 }
 0x309   :  { %v1868_v39 = vpop.eup %1867  ;;  %1623 = vmatprep.subr.mxu0 %v1554_v43  ;;  %v1552_v50 = vmul.f32 %v1866_v35, %v3282_v51  ;;  %v1551_v32 = vmul.f32 %v1866_v35, %v3268_v23 }
 0x30a   :  { %v1505_v33 = vpop.xlane.xlu1 %1504  ;;  %1624 = vmatpush1.msra.mxu0 %v1553_v31  ;;  %v1550_v57 = vmul.f32 %v1868_v39, %v3290_v19  ;;  %v1549_v12 = vmul.f32 %v1868_v39, %v3670_v18 }
 0x30b   :  { %1879 = vrcp.f32 %v1505_v33  ;;  %v1502_v24 = vpop.xlane.xlu0 %1501  ;;  %1625 = vmatprep.subr.mxu0 %v1552_v50 }
 0x30c   :  { %1881 = vrcp.f32 %v1502_v24  ;;  %v1870_v3 = vpop.eup %1869  ;;  %1626 = vmatpush1.msra.mxu0 %v1551_v32 }
 0x30d   :  { %v1872_v5 = vpop.eup %1871  ;;  %1627 = vmatprep.subr.mxu0 %v1550_v57  ;;  %v1548_v38 = vmul.f32 %v1870_v3, %v3298_v2  ;;  %v1547_v51 = vmul.f32 %v1870_v3, %v3292_v46  ;;  %v3671_v3 = vld [vmem:[#allocation23_spill] sm:$0xff] }
 0x30e   :  { %v1499_v15 = vpop.xlane.xlu1 %1498  ;;  %1628 = vmatpush1.msra.mxu0 %v1549_v12  ;;  %v1546_v23 = vmul.f32 %v1872_v5, %v3306_v45  ;;  %v1545_v37 = vmul.f32 %v1872_v5, %v3302_v28  ;;  %v3673_v12 = vld [vmem:[#allocation8_spill] sm:$0xff] }
 0x30f   :  { %1883 = vrcp.f32 %v1499_v15  ;;  %v1496_v42 = vpop.xlane.xlu0 %1495  ;;  %1629 = vmatprep.subr.mxu0 %v1548_v38  ;;  %v3672_v15 = vld [vmem:[#allocation24_spill] sm:$0xff] }
 0x310   :  { %1885 = vrcp.f32 %v1496_v42  ;;  %v1874_v63 = vpop.eup %1873  ;;  %1630 = vmatpush1.msra.mxu0 %v1547_v51  ;;  %v3675_v51 = vld [vmem:[#allocation28_spill] sm:$0xff] }
 0x311   :  { %1631 = vmatprep.subr.mxu0 %v1546_v23  ;;  %v1544_v36 = vmul.f32 %v1874_v63, %v3314_v9  ;;  %v1543_v52 = vmul.f32 %v1874_v63, %v3308_v41  ;;  %v3677_v63 = vld [vmem:[#allocation7_spill] sm:$0xff] }
 0x312   :  { %v1493_v19 = vpop.xlane.xlu1 %1492  ;;  %1632 = vmatpush1.msra.mxu0 %v1545_v37 }
 0x313   :  { %1887 = vrcp.f32 %v1493_v19  ;;  %v1490_v21 = vpop.xlane.xlu0 %1489  ;;  %1633 = vmatprep.subr.mxu0 %v1544_v36  ;;  %v3678_v36 = vld [vmem:[#allocation19_spill] sm:$0xff] }
 0x314   :  { %v1876_v2 = vpop.eup %1875  ;;  %1889 = vrcp.f32 %v1490_v21  ;;  %1634 = vmatpush1.msra.mxu0 %v1543_v52  ;;  %v3679_v21 = vld [vmem:[#allocation20_spill] sm:$0xff] }
 0x315   :  { %v1542_v46 = vmul.f32 %v1876_v2, %v3328_v49  ;;  %v1878_v16 = vpop.eup %1877  ;;  %v1541_v11 = vmul.f32 %v1876_v2, %v3324_v0 }
 0x316   :  { %v1487_v45 = vpop.xlane.xlu1 %1486  ;;  %v1604_v28 = vmul.f32 %v1878_v16, %v3322_v20  ;;  %v1603_v9 = vmul.f32 %v1878_v16, %v3318_v7  ;;  %v3680_v16 = vld [vmem:[#allocation25_spill] sm:$0xff] }
 0x317   :  { %1891 = vrcp.f32 %v1487_v45  ;;  %1635 = vmatprep.subr.mxu0 %v1542_v46  ;;  %v1484_v41 = vpop.xlane.xlu0 %1483 }
 0x318   :  { %v1880_v22 = vpop.eup %1879  ;;  %1636 = vmatpush1.msra.mxu0 %v1541_v11  ;;  %1893 = vrcp.f32 %v1484_v41  ;;  %v3681_v11 = vld [vmem:[#allocation27_spill] sm:$0xff] }
 0x319   :  { %1637 = vmatprep.subr.mxu0 %v1604_v28  ;;  %v1602_v34 = vmul.f32 %v1880_v22, %v3344_v25  ;;  %v1882_v59 = vpop.eup %1881  ;;  %v1601_v27 = vmul.f32 %v1880_v22, %v3339_v61 }
 0x31a   :  { %v1481_v49 = vpop.xlane.xlu1 %1480  ;;  %1638 = vmatpush2.msra.mxu0 %v1603_v9  ;;  %v1600_v0 = vmul.f32 %v1882_v59, %v3336_v29  ;;  %v1599_v20 = vmul.f32 %v1882_v59, %v3331_v58 }
 0x31b   :  { %1895 = vrcp.f32 %v1481_v49  ;;  %1639 = vmatprep.subr.mxu0 %v1602_v34  ;;  %v1478_v7 = vpop.xlane.xlu0 %1477  ;;  %v1917_v34 = vld [vmem:[%s3509_s0] sm:$0xff] }
 0x31c   :  { %v1884_v14 = vpop.eup %1883  ;;  %1640 = vmatpush2.msra.mxu0 %v1601_v27  ;;  %1897 = vrcp.f32 %v1478_v7 }
 0x31d   :  { %1641 = vmatprep.subr.mxu0 %v1600_v0  ;;  %v1598_v13 = vmul.f32 %v1884_v14, %v3360_v62  ;;  %v1886_v60 = vpop.eup %1885  ;;  %v1597_v4 = vmul.f32 %v1884_v14, %v3356_v6 }
 0x31e   :  { %v1475_v25 = vpop.xlane.xlu1 %1474  ;;  %1642 = vmatpush2.msra.mxu0 %v1599_v20  ;;  %v1596_v61 = vmul.f32 %v1886_v60, %v3354_v44  ;;  %v1595_v29 = vmul.f32 %v1886_v60, %v3348_v53 }
 0x31f   :  { %1899 = vrcp.f32 %v1475_v25  ;;  %1643 = vmatprep.subr.mxu0 %v1598_v13  ;;  %v1472_v58 = vpop.xlane.xlu0 %1471 }
 0x320   :  { %v1888_v30 = vpop.eup %1887  ;;  %1644 = vmatpush2.msra.mxu0 %v1597_v4  ;;  %1901 = vrcp.f32 %v1472_v58 }
 0x321   :  { %1645 = vmatprep.subr.mxu0 %v1596_v61  ;;  %v1594_v43 = vmul.f32 %v1888_v30, %v3374_v8  ;;  %v1890_v35 = vpop.eup %1889  ;;  %v1593_v33 = vmul.f32 %v1888_v30, %v3370_v1 }
 0x322   :  { %v1469_v62 = vpop.xlane.xlu1 %1468  ;;  %1646 = vmatpush2.msra.mxu0 %v1595_v29  ;;  %v1592_v6 = vmul.f32 %v1890_v35, %v3368_v47  ;;  %v1591_v44 = vmul.f32 %v1890_v35, %v3364_v54 }
 0x323   :  { %1903 = vrcp.f32 %v1469_v62  ;;  %1647 = vmatprep.subr.mxu0 %v1594_v43  ;;  %v1466_v53 = vpop.xlane.xlu0 %1465 }
 0x324   :  { %v1892_v31 = vpop.eup %1891  ;;  %1648 = vmatpush2.msra.mxu0 %v1593_v33  ;;  %1905 = vrcp.f32 %v1466_v53 }
 0x325   :  { %1649 = vmatprep.subr.mxu0 %v1592_v6  ;;  %v1590_v39 = vmul.f32 %v1892_v31, %v3388_v55  ;;  %v1894_v50 = vpop.eup %1893  ;;  %v1589_v32 = vmul.f32 %v1892_v31, %v3384_v48 }
 0x326   :  { %v1463_v8 = vpop.xlane.xlu1 %1462  ;;  %1650 = vmatpush2.msra.mxu0 %v1591_v44  ;;  %v1588_v1 = vmul.f32 %v1894_v50, %v3382_v17  ;;  %v1587_v47 = vmul.f32 %v1894_v50, %v3378_v26  ;;  %v3674_v17 = vld [vmem:[#allocation26_spill] sm:$0xff] }
 0x327   :  { %1907 = vrcp.f32 %v1463_v8  ;;  %1651 = vmatprep.subr.mxu0 %v1590_v39 }
 0x328   :  { %v1896_v24 = vpop.eup %1895  ;;  %1652 = vmatpush2.msra.mxu0 %v1589_v32 }
 0x329   :  { %1653 = vmatprep.subr.mxu0 %v1588_v1  ;;  %v1586_v54 = vmul.f32 %v1896_v24, %v3400_v10  ;;  %v1898_v57 = vpop.eup %1897  ;;  %v1585_v55 = vmul.f32 %v1896_v24, %v3671_v3  ;;  %v3676_v10 = vld [vmem:[#allocation29_spill] sm:$0xff] }
 0x32a   :  { %1654 = vmatpush2.msra.mxu0 %v1587_v47  ;;  %v1584_v18 = vmul.f32 %v1898_v57, %v3672_v15  ;;  %v1583_v48 = vmul.f32 %v1898_v57, %v3673_v12 }
 0x32b   :  { %1655 = vmatprep.subr.mxu0 %v1586_v54 }
 0x32c   :  { %v1900_v5 = vpop.eup %1899  ;;  %1656 = vmatpush2.msra.mxu0 %v1585_v55 }
 0x32d   :  { %1657 = vmatprep.subr.mxu0 %v1584_v18  ;;  %v1582_v38 = vmul.f32 %v1900_v5, %v3674_v17  ;;  %v1902_v26 = vpop.eup %1901  ;;  %v1581_v42 = vmul.f32 %v1900_v5, %v3675_v51 }
 0x32e   :  { %1658 = vmatpush2.msra.mxu0 %v1583_v48  ;;  %v1580_v23 = vmul.f32 %v1902_v26, %v3676_v10  ;;  %v1579_v19 = vmul.f32 %v1902_v26, %v3677_v63 }
 0x32f   :  { %1659 = vmatprep.subr.mxu0 %v1582_v38 }
 0x330   :  { %v1904_v37 = vpop.eup %1903  ;;  %1660 = vmatpush2.msra.mxu0 %v1581_v42 }
 0x331   :  { %1661 = vmatprep.subr.mxu0 %v1580_v23  ;;  %v1578_v52 = vmul.f32 %v1904_v37, %v3678_v36  ;;  %v1906_v2 = vpop.eup %1905  ;;  %v1577_v46 = vmul.f32 %v1904_v37, %v3679_v21 }
 0x332   :  { %1662 = vmatpush2.msra.mxu0 %v1579_v19  ;;  %v1576_v45 = vmul.f32 %v1906_v2, %v3680_v16  ;;  %v1575_v28 = vmul.f32 %v1906_v2, %v3681_v11 }
 0x333   :  { %1663 = vmatprep.subr.mxu0 %v1578_v52 }
 0x334   :  { %v1908_v9 = vpop.eup %1907  ;;  %1664 = vmatpush2.msra.mxu0 %v1577_v46 }
 0x335   :  { %1665 = vmatprep.subr.mxu0 %v1576_v45  ;;  %v1574_v22 = vmul.f32 %v1908_v9, %v3430_v40  ;;  %v1573_v41 = vmul.f32 %v1908_v9, %v3428_v56 }
 0x336   :  { %1666 = vmatpush2.msra.mxu0 %v1575_v28 }
 0x337   :  { %1667 = vmatprep.subr.mxu0 %v1574_v22 }
 0x338   :  { %1668 = vmatpush2.msra.mxu0 %v1573_v41 }
 0x339   :  { %1670 = vmatmul.mubr.f32.vlgmr.msra.gmra.mxu0 %v1917_v34 }
 0x3f9   :  { %v1671_v59 = vpop.f32.mrf.mxu0 }
 0x3fa   :  { %v1710_v49 = vmul.f32 -1.442695, %v1671_v59 }
 0x3fb   :  { %v1673_v27 = vpop.f32.mrf.mxu0 }
 0x3fc   :  { %1909 = vpow2.f32 %v1710_v49  ;;  %v1711_v0 = vmul.f32 -1.442695, %v1673_v27 }
 0x3fe   :  { %1911 = vpow2.f32 %v1711_v0 }
 0x409   :  { %v1910_v20 = vpop.eup %1909 }
 0x40a   :  { %v1682_v14 = vadd.f32 1.0, %v1910_v20 }
 0x40b   :  { %v1912_v7 = vpop.eup %1911 }
 0x40c   :  { %1913 = vrcp.f32 %v1682_v14  ;;  %v1683_v40 = vadd.f32 1.0, %v1912_v7 }
 0x40e   :  { %1915 = vrcp.f32 %v1683_v40 }
 0x419   :  { %v1914_v56 = vpop.eup %1913 }
 0x41a   :  { %1688 = vst [vmem:[%s3513_s4] sm:$0xff] %v1914_v56 }
 0x41b   :  { %v1916_v13 = vpop.eup %1915 }
 0x41c   :  { %1689 = vst [vmem:[%s3513_s4 + $0x8] sm:$0xff] %v1916_v13 }
 0x41d   :  { %1694 = vsyncpa [#allocation3], 1 }

</bundles_post_ra>
